<compile_context>
chip_gen: v7x
topology: tpu7x:2x2x1
jax: 0.10.0
libtpu: 0.0.40
codegen_flags: <defaults>
</compile_context>

<pallas_src>
import functools

import numpy as np
import jax
import jax.numpy as jnp
from jax import lax
from jax.experimental import pallas as pl
from jax.experimental.pallas import tpu as pltpu


# --------------------------------------------------------------------------
# Pallas kernel: fused conv3x3+BN+ReLU -> conv3x3+BN -> +residual -> ReLU
# --------------------------------------------------------------------------
def _fused_basic_block_kernel(x_ref, mask_ref, w1_ref, b1_ref, w2_ref, b2_ref,
                              o_ref, patch_ref, *, Cpad, W, L):
    """One block of B images per grid step (images concatenated on lanes).

    x_ref:     (1, Cpad, L)   f32   input, channels zero-padded, L = B*H*W
    mask_ref:  (9, L)         f32   per-tap "SAME" boundary masks (0/1)
    w*_ref:    (Cpad, 9*Cpad) bf16  packed conv weights, BN scale folded in
    b*_ref:    (Cpad, 1)      f32   folded BN bias
    o_ref:     (1, Cpad, L)   f32   output block (channel-padded, lane-dense)
    patch_ref: (9*Cpad, L)    bf16  VMEM scratch: im2col patch matrix
    """

    def conv3x3_bn(inp, w_ref_, b_ref_):
        # im2col: 9 taps = lane rolls (XLU) + boundary masks, stored as bf16.
        for ky in range(3):
            for kx in range(3):
                k = ky * 3 + kx
                tap = (ky - 1) * W + (kx - 1)          # flat-space tap offset
                if tap == 0:
                    blk = inp                          # center tap: no roll, mask all-ones
                else:
                    rolled = pltpu.roll(inp, shift=(-tap) % L, axis=1)
                    blk = rolled * mask_ref[k:k + 1, :]   # zero out-of-image taps
                patch_ref[k * Cpad:(k + 1) * Cpad, :] = blk.astype(jnp.bfloat16)
        y = jnp.dot(w_ref_[...], patch_ref[...],       # one MXU matmul, K = 9*Cpad
                    preferred_element_type=jnp.float32)
        return y + b_ref_[...]                         # (Cpad, L) f32

    # stage 1: conv1 + bn1 (scale folded into w1) + relu
    y1 = jnp.maximum(conv3x3_bn(x_ref[0], w1_ref, b1_ref), 0.0)
    # dropout(p=0.2) is identity in eval mode
    # stage 2: conv2 + bn2 + residual + relu; residual re-read from VMEM here
    o_ref[0] = jnp.maximum(conv3x3_bn(y1, w2_ref, b2_ref) + x_ref[0], 0.0)


# --------------------------------------------------------------------------
# Wrapper-side prep (tiny, amortized)
# --------------------------------------------------------------------------
def _fold_bn(gamma, beta, mean, var, eps=1e-5):
    scale = gamma / jnp.sqrt(var + eps)
    bias = beta - mean * scale
    return scale.astype(jnp.float32), bias.astype(jnp.float32)


def _tap_masks(h, w, b):
    """(9, b*h*w) float32 'SAME'-padding validity masks, one row per 3x3 tap."""
    ys = np.arange(h)[:, None]
    xs = np.arange(w)[None, :]
    masks = []
    for ky in range(3):
        for kx in range(3):
            dy, dx = ky - 1, kx - 1
            valid = ((ys + dy >= 0) & (ys + dy < h) &
                     (xs + dx >= 0) & (xs + dx < w))
            masks.append(valid.reshape(-1))
    m = np.stack(masks).astype(np.float32)            # (9, h*w)
    return np.tile(m, (1, b))                         # (9, b*h*w)


def _pack_conv_weight(w_oihw, scale, c_pad):
    """(Cout, Cin, 3, 3) OIHW -> (c_pad, 9*c_pad) bf16, BN scale folded in.

    Row co, column (ky*3+kx)*c_pad + ci holds scale[co] * w[co, ci, ky, kx]."""
    cout, cin = w_oihw.shape[0], w_oihw.shape[1]
    w = jnp.transpose(w_oihw, (0, 2, 3, 1)) * scale[:, None, None, None]
    w = jnp.pad(w, ((0, c_pad - cout), (0, 0), (0, 0), (0, c_pad - cin)))
    return w.reshape(c_pad, 9 * c_pad).astype(jnp.bfloat16)


# --------------------------------------------------------------------------
# BasicBlock forward (single fused pallas_call)
# --------------------------------------------------------------------------
@jax.jit
def basic_block_forward(x_nchw, params):
    """Inference-mode BasicBlock forward (stride=1, no downsample). x: (N,C,H,W) f32."""
    x = x_nchw.astype(jnp.float32)
    N, C, H, W = x.shape
    HW = H * W
    Cpad = ((C + 15) // 16) * 16            # 16-align channels (bf16 sublane tile)
    B = max(1, min(N, 4096 // HW))          # images packed per grid step (lane axis)
    nb = -(-N // B)
    Npad = nb * B
    L = B * HW

    s1, b1 = _fold_bn(params["bn1_gamma"], params["bn1_beta"],
                      params["bn1_mean"], params["bn1_var"])
    s2, b2 = _fold_bn(params["bn2_gamma"], params["bn2_beta"],
                      params["bn2_mean"], params["bn2_var"])
    w1p = _pack_conv_weight(params["conv1_w"], s1, Cpad)     # (Cpad, 9*Cpad) bf16
    w2p = _pack_conv_weight(params["conv2_w"], s2, Cpad)
    b1p = jnp.pad(b1, (0, Cpad - C)).reshape(Cpad, 1)
    b2p = jnp.pad(b2, (0, Cpad - C)).reshape(Cpad, 1)

    # (N,C,HW) -> pad N/C -> pack B images side-by-side on the lane axis.
    x2d = jnp.pad(x.reshape(N, C, HW), ((0, Npad - N), (0, Cpad - C), (0, 0)))
    xb = x2d.reshape(nb, B, Cpad, HW).transpose(0, 2, 1, 3).reshape(nb, Cpad, L)
    masks = jnp.asarray(_tap_masks(H, W, B))                 # (9, L) compile-time const

    kernel = functools.partial(_fused_basic_block_kernel, Cpad=Cpad, W=W, L=L)
    out = pl.pallas_call(
        kernel,
        out_shape=jax.ShapeDtypeStruct((nb, Cpad, L), jnp.float32),
        grid=(nb,),
        in_specs=[
            pl.BlockSpec((1, Cpad, L), lambda n: (n, 0, 0)),     # x
            pl.BlockSpec((9, L), lambda n: (0, 0)),              # tap masks
            pl.BlockSpec((Cpad, 9 * Cpad), lambda n: (0, 0)),    # w1 (BN1 folded)
            pl.BlockSpec((Cpad, 1), lambda n: (0, 0)),           # b1
            pl.BlockSpec((Cpad, 9 * Cpad), lambda n: (0, 0)),    # w2 (BN2 folded)
            pl.BlockSpec((Cpad, 1), lambda n: (0, 0)),           # b2
        ],
        out_specs=pl.BlockSpec((1, Cpad, L), lambda n: (n, 0, 0)),
        scratch_shapes=[pltpu.VMEM((9 * Cpad, L), jnp.bfloat16)],   # bf16 im2col scratch
        compiler_params=pltpu.CompilerParams(
            dimension_semantics=("parallel",),
            vmem_limit_bytes=48 * 1024 * 1024),
    )(xb, masks, w1p, b1p, w2p, b2p)

    # Unpack: lane-axis images back to batch axis, drop channel/batch padding.
    out = out.reshape(nb, Cpad, B, HW).transpose(0, 2, 1, 3).reshape(Npad, Cpad, HW)
    return out[:N, :C].reshape(N, C, H, W)


# --------------------------------------------------------------------------
# Pure-JAX reference with matching numerics (bf16 conv operands, f32 accum)
# --------------------------------------------------------------------------
def reference_forward(x_nchw, params):
    x = x_nchw.astype(jnp.float32)
    s1, b1 = _fold_bn(params["bn1_gamma"], params["bn1_beta"],
                      params["bn1_mean"], params["bn1_var"])
    s2, b2 = _fold_bn(params["bn2_gamma"], params["bn2_beta"],
                      params["bn2_mean"], params["bn2_var"])
    w1 = (params["conv1_w"] * s1[:, None, None, None]).astype(jnp.bfloat16)
    w2 = (params["conv2_w"] * s2[:, None, None, None]).astype(jnp.bfloat16)
    dn = lax.conv_dimension_numbers(x.shape, w1.shape, ("NCHW", "OIHW", "NCHW"))

    def conv(a, w):
        return lax.conv_general_dilated(a.astype(jnp.bfloat16), w, (1, 1), "SAME",
                                        dimension_numbers=dn,
                                        preferred_element_type=jnp.float32)

    y = jnp.maximum(conv(x, w1) + b1[None, :, None, None], 0.0)
    y = jnp.maximum(conv(y, w2) + b2[None, :, None, None] + x, 0.0)
    return y


# --------------------------------------------------------------------------
if __name__ == "__main__":
    # Small deterministic setup: N=2, Cin=Cout=4, H=W=16, stride=1, no downsample.
    N, C, H, W = 2, 4, 16, 16
    key = jax.random.PRNGKey(0)
    k = jax.random.split(key, 8)

    x = jax.random.normal(k[0], (N, C, H, W), jnp.float32)
    params = {
        "conv1_w": 0.1 * jax.random.normal(k[1], (C, C, 3, 3), jnp.float32),
        "conv2_w": 0.1 * jax.random.normal(k[2], (C, C, 3, 3), jnp.float32),
        "bn1_gamma": 1.0 + 0.1 * jax.random.normal(k[3], (C,), jnp.float32),
        "bn1_beta": 0.1 * jax.random.normal(k[4], (C,), jnp.float32),
        "bn1_mean": 0.05 * jax.random.normal(k[5], (C,), jnp.float32),
        "bn1_var": jnp.abs(1.0 + 0.1 * jax.random.normal(k[6], (C,), jnp.float32)),
        "bn2_gamma": 1.0 + 0.1 * jax.random.normal(k[7], (C,), jnp.float32),
        "bn2_beta": jnp.zeros((C,), jnp.float32),
        "bn2_mean": jnp.zeros((C,), jnp.float32),
        "bn2_var": jnp.ones((C,), jnp.float32),
    }

    out = jax.block_until_ready(basic_block_forward(x, params))
    ref = reference_forward(x, params)

    assert out.shape == (N, C, H, W), out.shape
    assert jnp.allclose(out, ref, atol=1e-3, rtol=1e-3), \
        float(jnp.max(jnp.abs(out - ref)))

    print("KERNEL_OK")
</pallas_src>

<mosaic_0001>
module attributes {stable_mosaic.version = 11 : i64} {
  func.func @_fused_basic_block_kernel(%arg0: i32, %arg1: memref<1x16x512xf32, #tpu.memory_space<vmem>>, %arg2: memref<9x512xf32, #tpu.memory_space<vmem>>, %arg3: memref<16x144xbf16, #tpu.memory_space<vmem>>, %arg4: memref<16x1xf32, #tpu.memory_space<vmem>>, %arg5: memref<16x144xbf16, #tpu.memory_space<vmem>>, %arg6: memref<16x1xf32, #tpu.memory_space<vmem>>, %arg7: memref<1x16x512xf32, #tpu.memory_space<vmem>>, %arg8: memref<144x512xbf16, #tpu.memory_space<vmem>>) attributes {dimension_semantics = [#tpu.dimension_semantics<parallel>], iteration_bounds = array<i64: 1>, scalar_prefetch = 0 : i64, scratch_operands = 1 : i64, tpu.core_type = #tpu.core_type<tc>, window_params = [{transform_indices = @transform_0, window_bounds = array<i64: 1, 16, 512>}, {pipeline_mode = #tpu.pipeline_mode<synchronous>, transform_indices = @transform_1, window_bounds = array<i64: 9, 512>}, {pipeline_mode = #tpu.pipeline_mode<synchronous>, transform_indices = @transform_2, window_bounds = array<i64: 16, 144>}, {pipeline_mode = #tpu.pipeline_mode<synchronous>, transform_indices = @transform_3, window_bounds = array<i64: 16, 1>}, {pipeline_mode = #tpu.pipeline_mode<synchronous>, transform_indices = @transform_4, window_bounds = array<i64: 16, 144>}, {pipeline_mode = #tpu.pipeline_mode<synchronous>, transform_indices = @transform_5, window_bounds = array<i64: 16, 1>}, {transform_indices = @transform_6, window_bounds = array<i64: 1, 16, 512>}]} {
    %c0 = arith.constant 0 : index
    %c0_0 = arith.constant 0 : index
    %c0_1 = arith.constant 0 : index
    %0 = vector.load %arg1[%c0, %c0_0, %c0_1] : memref<1x16x512xf32, #tpu.memory_space<vmem>>, vector<1x16x512xf32>
    %1 = vector.shape_cast %0 : vector<1x16x512xf32> to vector<16x512xf32>
    %c17_i32 = arith.constant 17 : i32
    %2 = tpu.dynamic_rotate %1 by %c17_i32 dim 1 : vector<16x512xf32>, i32 -> vector<16x512xf32>
    %c0_2 = arith.constant 0 : index
    %c0_3 = arith.constant 0 : index
    %3 = vector.load %arg2[%c0_2, %c0_3] : memref<9x512xf32, #tpu.memory_space<vmem>>, vector<1x512xf32>
    %4 = vector.broadcast %3 : vector<1x512xf32> to vector<16x512xf32>
    %5 = arith.mulf %2, %4 : vector<16x512xf32>
    %6 = arith.truncf %5 : vector<16x512xf32> to vector<16x512xbf16>
    %c0_4 = arith.constant 0 : index
    %c0_5 = arith.constant 0 : index
    %7 = vector.load %arg8[%c0_4, %c0_5] : memref<144x512xbf16, #tpu.memory_space<vmem>>, vector<16x512xbf16>
    tpu.vector_store %arg8[%c0_4, %c0_5], %6 {strides = array<i32>} : memref<144x512xbf16, #tpu.memory_space<vmem>>, vector<16x512xbf16>,
    %c16_i32 = arith.constant 16 : i32
    %8 = tpu.dynamic_rotate %1 by %c16_i32 dim 1 : vector<16x512xf32>, i32 -> vector<16x512xf32>
    %c1 = arith.constant 1 : index
    %c0_6 = arith.constant 0 : index
    %9 = vector.load %arg2[%c1, %c0_6] : memref<9x512xf32, #tpu.memory_space<vmem>>, vector<1x512xf32>
    %10 = vector.broadcast %9 : vector<1x512xf32> to vector<16x512xf32>
    %11 = arith.mulf %8, %10 : vector<16x512xf32>
    %12 = arith.truncf %11 : vector<16x512xf32> to vector<16x512xbf16>
    %c16 = arith.constant 16 : index
    %c0_7 = arith.constant 0 : index
    %13 = vector.load %arg8[%c16, %c0_7] : memref<144x512xbf16, #tpu.memory_space<vmem>>, vector<16x512xbf16>
    tpu.vector_store %arg8[%c16, %c0_7], %12 {strides = array<i32>} : memref<144x512xbf16, #tpu.memory_space<vmem>>, vector<16x512xbf16>,
    %c15_i32 = arith.constant 15 : i32
    %14 = tpu.dynamic_rotate %1 by %c15_i32 dim 1 : vector<16x512xf32>, i32 -> vector<16x512xf32>
    %c2 = arith.constant 2 : index
    %c0_8 = arith.constant 0 : index
    %15 = vector.load %arg2[%c2, %c0_8] : memref<9x512xf32, #tpu.memory_space<vmem>>, vector<1x512xf32>
    %16 = vector.broadcast %15 : vector<1x512xf32> to vector<16x512xf32>
    %17 = arith.mulf %14, %16 : vector<16x512xf32>
    %18 = arith.truncf %17 : vector<16x512xf32> to vector<16x512xbf16>
    %c32 = arith.constant 32 : index
    %c0_9 = arith.constant 0 : index
    %19 = vector.load %arg8[%c32, %c0_9] : memref<144x512xbf16, #tpu.memory_space<vmem>>, vector<16x512xbf16>
    tpu.vector_store %arg8[%c32, %c0_9], %18 {strides = array<i32>} : memref<144x512xbf16, #tpu.memory_space<vmem>>, vector<16x512xbf16>,
    %c1_i32 = arith.constant 1 : i32
    %20 = tpu.dynamic_rotate %1 by %c1_i32 dim 1 : vector<16x512xf32>, i32 -> vector<16x512xf32>
    %c3 = arith.constant 3 : index
    %c0_10 = arith.constant 0 : index
    %21 = vector.load %arg2[%c3, %c0_10] : memref<9x512xf32, #tpu.memory_space<vmem>>, vector<1x512xf32>
    %22 = vector.broadcast %21 : vector<1x512xf32> to vector<16x512xf32>
    %23 = arith.mulf %20, %22 : vector<16x512xf32>
    %24 = arith.truncf %23 : vector<16x512xf32> to vector<16x512xbf16>
    %c48 = arith.constant 48 : index
    %c0_11 = arith.constant 0 : index
    %25 = vector.load %arg8[%c48, %c0_11] : memref<144x512xbf16, #tpu.memory_space<vmem>>, vector<16x512xbf16>
    tpu.vector_store %arg8[%c48, %c0_11], %24 {strides = array<i32>} : memref<144x512xbf16, #tpu.memory_space<vmem>>, vector<16x512xbf16>,
    %26 = arith.truncf %1 : vector<16x512xf32> to vector<16x512xbf16>
    %c64 = arith.constant 64 : index
    %c0_12 = arith.constant 0 : index
    %27 = vector.load %arg8[%c64, %c0_12] : memref<144x512xbf16, #tpu.memory_space<vmem>>, vector<16x512xbf16>
    tpu.vector_store %arg8[%c64, %c0_12], %26 {strides = array<i32>} : memref<144x512xbf16, #tpu.memory_space<vmem>>, vector<16x512xbf16>,
    %c511_i32 = arith.constant 511 : i32
    %28 = tpu.dynamic_rotate %1 by %c511_i32 dim 1 : vector<16x512xf32>, i32 -> vector<16x512xf32>
    %c5 = arith.constant 5 : index
    %c0_13 = arith.constant 0 : index
    %29 = vector.load %arg2[%c5, %c0_13] : memref<9x512xf32, #tpu.memory_space<vmem>>, vector<1x512xf32>
    %30 = vector.broadcast %29 : vector<1x512xf32> to vector<16x512xf32>
    %31 = arith.mulf %28, %30 : vector<16x512xf32>
    %32 = arith.truncf %31 : vector<16x512xf32> to vector<16x512xbf16>
    %c80 = arith.constant 80 : index
    %c0_14 = arith.constant 0 : index
    %33 = vector.load %arg8[%c80, %c0_14] : memref<144x512xbf16, #tpu.memory_space<vmem>>, vector<16x512xbf16>
    tpu.vector_store %arg8[%c80, %c0_14], %32 {strides = array<i32>} : memref<144x512xbf16, #tpu.memory_space<vmem>>, vector<16x512xbf16>,
    %c497_i32 = arith.constant 497 : i32
    %34 = tpu.dynamic_rotate %1 by %c497_i32 dim 1 : vector<16x512xf32>, i32 -> vector<16x512xf32>
    %c6 = arith.constant 6 : index
    %c0_15 = arith.constant 0 : index
    %35 = vector.load %arg2[%c6, %c0_15] : memref<9x512xf32, #tpu.memory_space<vmem>>, vector<1x512xf32>
    %36 = vector.broadcast %35 : vector<1x512xf32> to vector<16x512xf32>
    %37 = arith.mulf %34, %36 : vector<16x512xf32>
    %38 = arith.truncf %37 : vector<16x512xf32> to vector<16x512xbf16>
    %c96 = arith.constant 96 : index
    %c0_16 = arith.constant 0 : index
    %39 = vector.load %arg8[%c96, %c0_16] : memref<144x512xbf16, #tpu.memory_space<vmem>>, vector<16x512xbf16>
    tpu.vector_store %arg8[%c96, %c0_16], %38 {strides = array<i32>} : memref<144x512xbf16, #tpu.memory_space<vmem>>, vector<16x512xbf16>,
    %c496_i32 = arith.constant 496 : i32
    %40 = tpu.dynamic_rotate %1 by %c496_i32 dim 1 : vector<16x512xf32>, i32 -> vector<16x512xf32>
    %c7 = arith.constant 7 : index
    %c0_17 = arith.constant 0 : index
    %41 = vector.load %arg2[%c7, %c0_17] : memref<9x512xf32, #tpu.memory_space<vmem>>, vector<1x512xf32>
    %42 = vector.broadcast %41 : vector<1x512xf32> to vector<16x512xf32>
    %43 = arith.mulf %40, %42 : vector<16x512xf32>
    %44 = arith.truncf %43 : vector<16x512xf32> to vector<16x512xbf16>
    %c112 = arith.constant 112 : index
    %c0_18 = arith.constant 0 : index
    %45 = vector.load %arg8[%c112, %c0_18] : memref<144x512xbf16, #tpu.memory_space<vmem>>, vector<16x512xbf16>
    tpu.vector_store %arg8[%c112, %c0_18], %44 {strides = array<i32>} : memref<144x512xbf16, #tpu.memory_space<vmem>>, vector<16x512xbf16>,
    %c495_i32 = arith.constant 495 : i32
    %46 = tpu.dynamic_rotate %1 by %c495_i32 dim 1 : vector<16x512xf32>, i32 -> vector<16x512xf32>
    %c8 = arith.constant 8 : index
    %c0_19 = arith.constant 0 : index
    %47 = vector.load %arg2[%c8, %c0_19] : memref<9x512xf32, #tpu.memory_space<vmem>>, vector<1x512xf32>
    %48 = vector.broadcast %47 : vector<1x512xf32> to vector<16x512xf32>
    %49 = arith.mulf %46, %48 : vector<16x512xf32>
    %50 = arith.truncf %49 : vector<16x512xf32> to vector<16x512xbf16>
    %c128 = arith.constant 128 : index
    %c0_20 = arith.constant 0 : index
    %51 = vector.load %arg8[%c128, %c0_20] : memref<144x512xbf16, #tpu.memory_space<vmem>>, vector<16x512xbf16>
    tpu.vector_store %arg8[%c128, %c0_20], %50 {strides = array<i32>} : memref<144x512xbf16, #tpu.memory_space<vmem>>, vector<16x512xbf16>,
    %c0_21 = arith.constant 0 : index
    %c0_22 = arith.constant 0 : index
    %52 = vector.load %arg3[%c0_21, %c0_22] : memref<16x144xbf16, #tpu.memory_space<vmem>>, vector<16x144xbf16>
    %c0_23 = arith.constant 0 : index
    %c0_24 = arith.constant 0 : index
    %53 = vector.load %arg8[%c0_23, %c0_24] : memref<144x512xbf16, #tpu.memory_space<vmem>>, vector<144x512xbf16>
    %cst = arith.constant dense<0.000000e+00> : vector<16x512xf32>
    %54 = tpu.matmul %52, %53, %cst {dimension_numbers = #tpu.dot_dimension_numbers<[1], [0], [0], [1], [0, 0, 1, 1], [], []>} : vector<16x144xbf16>, vector<144x512xbf16>, vector<16x512xf32> -> vector<16x512xf32>
    %c0_25 = arith.constant 0 : index
    %c0_26 = arith.constant 0 : index
    %55 = vector.load %arg4[%c0_25, %c0_26] : memref<16x1xf32, #tpu.memory_space<vmem>>, vector<16x1xf32>
    %56 = vector.broadcast %55 : vector<16x1xf32> to vector<16x512xf32>
    %57 = arith.addf %54, %56 : vector<16x512xf32>
    %cst_27 = arith.constant 0.000000e+00 : f32
    %58 = vector.broadcast %cst_27 : f32 to vector<16x512xf32>
    %59 = arith.maximumf %57, %58 : vector<16x512xf32>
    %c17_i32_28 = arith.constant 17 : i32
    %60 = tpu.dynamic_rotate %59 by %c17_i32_28 dim 1 : vector<16x512xf32>, i32 -> vector<16x512xf32>
    %c0_29 = arith.constant 0 : index
    %c0_30 = arith.constant 0 : index
    %61 = vector.load %arg2[%c0_29, %c0_30] : memref<9x512xf32, #tpu.memory_space<vmem>>, vector<1x512xf32>
    %62 = vector.broadcast %61 : vector<1x512xf32> to vector<16x512xf32>
    %63 = arith.mulf %60, %62 : vector<16x512xf32>
    %64 = arith.truncf %63 : vector<16x512xf32> to vector<16x512xbf16>
    %c0_31 = arith.constant 0 : index
    %c0_32 = arith.constant 0 : index
    %65 = vector.load %arg8[%c0_31, %c0_32] : memref<144x512xbf16, #tpu.memory_space<vmem>>, vector<16x512xbf16>
    tpu.vector_store %arg8[%c0_31, %c0_32], %64 {strides = array<i32>} : memref<144x512xbf16, #tpu.memory_space<vmem>>, vector<16x512xbf16>,
    %c16_i32_33 = arith.constant 16 : i32
    %66 = tpu.dynamic_rotate %59 by %c16_i32_33 dim 1 : vector<16x512xf32>, i32 -> vector<16x512xf32>
    %c1_34 = arith.constant 1 : index
    %c0_35 = arith.constant 0 : index
    %67 = vector.load %arg2[%c1_34, %c0_35] : memref<9x512xf32, #tpu.memory_space<vmem>>, vector<1x512xf32>
    %68 = vector.broadcast %67 : vector<1x512xf32> to vector<16x512xf32>
    %69 = arith.mulf %66, %68 : vector<16x512xf32>
    %70 = arith.truncf %69 : vector<16x512xf32> to vector<16x512xbf16>
    %c16_36 = arith.constant 16 : index
    %c0_37 = arith.constant 0 : index
    %71 = vector.load %arg8[%c16_36, %c0_37] : memref<144x512xbf16, #tpu.memory_space<vmem>>, vector<16x512xbf16>
    tpu.vector_store %arg8[%c16_36, %c0_37], %70 {strides = array<i32>} : memref<144x512xbf16, #tpu.memory_space<vmem>>, vector<16x512xbf16>,
    %c15_i32_38 = arith.constant 15 : i32
    %72 = tpu.dynamic_rotate %59 by %c15_i32_38 dim 1 : vector<16x512xf32>, i32 -> vector<16x512xf32>
    %c2_39 = arith.constant 2 : index
    %c0_40 = arith.constant 0 : index
    %73 = vector.load %arg2[%c2_39, %c0_40] : memref<9x512xf32, #tpu.memory_space<vmem>>, vector<1x512xf32>
    %74 = vector.broadcast %73 : vector<1x512xf32> to vector<16x512xf32>
    %75 = arith.mulf %72, %74 : vector<16x512xf32>
    %76 = arith.truncf %75 : vector<16x512xf32> to vector<16x512xbf16>
    %c32_41 = arith.constant 32 : index
    %c0_42 = arith.constant 0 : index
    %77 = vector.load %arg8[%c32_41, %c0_42] : memref<144x512xbf16, #tpu.memory_space<vmem>>, vector<16x512xbf16>
    tpu.vector_store %arg8[%c32_41, %c0_42], %76 {strides = array<i32>} : memref<144x512xbf16, #tpu.memory_space<vmem>>, vector<16x512xbf16>,
    %c1_i32_43 = arith.constant 1 : i32
    %78 = tpu.dynamic_rotate %59 by %c1_i32_43 dim 1 : vector<16x512xf32>, i32 -> vector<16x512xf32>
    %c3_44 = arith.constant 3 : index
    %c0_45 = arith.constant 0 : index
    %79 = vector.load %arg2[%c3_44, %c0_45] : memref<9x512xf32, #tpu.memory_space<vmem>>, vector<1x512xf32>
    %80 = vector.broadcast %79 : vector<1x512xf32> to vector<16x512xf32>
    %81 = arith.mulf %78, %80 : vector<16x512xf32>
    %82 = arith.truncf %81 : vector<16x512xf32> to vector<16x512xbf16>
    %c48_46 = arith.constant 48 : index
    %c0_47 = arith.constant 0 : index
    %83 = vector.load %arg8[%c48_46, %c0_47] : memref<144x512xbf16, #tpu.memory_space<vmem>>, vector<16x512xbf16>
    tpu.vector_store %arg8[%c48_46, %c0_47], %82 {strides = array<i32>} : memref<144x512xbf16, #tpu.memory_space<vmem>>, vector<16x512xbf16>,
    %84 = arith.truncf %59 : vector<16x512xf32> to vector<16x512xbf16>
    %c64_48 = arith.constant 64 : index
    %c0_49 = arith.constant 0 : index
    %85 = vector.load %arg8[%c64_48, %c0_49] : memref<144x512xbf16, #tpu.memory_space<vmem>>, vector<16x512xbf16>
    tpu.vector_store %arg8[%c64_48, %c0_49], %84 {strides = array<i32>} : memref<144x512xbf16, #tpu.memory_space<vmem>>, vector<16x512xbf16>,
    %c511_i32_50 = arith.constant 511 : i32
    %86 = tpu.dynamic_rotate %59 by %c511_i32_50 dim 1 : vector<16x512xf32>, i32 -> vector<16x512xf32>
    %c5_51 = arith.constant 5 : index
    %c0_52 = arith.constant 0 : index
    %87 = vector.load %arg2[%c5_51, %c0_52] : memref<9x512xf32, #tpu.memory_space<vmem>>, vector<1x512xf32>
    %88 = vector.broadcast %87 : vector<1x512xf32> to vector<16x512xf32>
    %89 = arith.mulf %86, %88 : vector<16x512xf32>
    %90 = arith.truncf %89 : vector<16x512xf32> to vector<16x512xbf16>
    %c80_53 = arith.constant 80 : index
    %c0_54 = arith.constant 0 : index
    %91 = vector.load %arg8[%c80_53, %c0_54] : memref<144x512xbf16, #tpu.memory_space<vmem>>, vector<16x512xbf16>
    tpu.vector_store %arg8[%c80_53, %c0_54], %90 {strides = array<i32>} : memref<144x512xbf16, #tpu.memory_space<vmem>>, vector<16x512xbf16>,
    %c497_i32_55 = arith.constant 497 : i32
    %92 = tpu.dynamic_rotate %59 by %c497_i32_55 dim 1 : vector<16x512xf32>, i32 -> vector<16x512xf32>
    %c6_56 = arith.constant 6 : index
    %c0_57 = arith.constant 0 : index
    %93 = vector.load %arg2[%c6_56, %c0_57] : memref<9x512xf32, #tpu.memory_space<vmem>>, vector<1x512xf32>
    %94 = vector.broadcast %93 : vector<1x512xf32> to vector<16x512xf32>
    %95 = arith.mulf %92, %94 : vector<16x512xf32>
    %96 = arith.truncf %95 : vector<16x512xf32> to vector<16x512xbf16>
    %c96_58 = arith.constant 96 : index
    %c0_59 = arith.constant 0 : index
    %97 = vector.load %arg8[%c96_58, %c0_59] : memref<144x512xbf16, #tpu.memory_space<vmem>>, vector<16x512xbf16>
    tpu.vector_store %arg8[%c96_58, %c0_59], %96 {strides = array<i32>} : memref<144x512xbf16, #tpu.memory_space<vmem>>, vector<16x512xbf16>,
    %c496_i32_60 = arith.constant 496 : i32
    %98 = tpu.dynamic_rotate %59 by %c496_i32_60 dim 1 : vector<16x512xf32>, i32 -> vector<16x512xf32>
    %c7_61 = arith.constant 7 : index
    %c0_62 = arith.constant 0 : index
    %99 = vector.load %arg2[%c7_61, %c0_62] : memref<9x512xf32, #tpu.memory_space<vmem>>, vector<1x512xf32>
    %100 = vector.broadcast %99 : vector<1x512xf32> to vector<16x512xf32>
    %101 = arith.mulf %98, %100 : vector<16x512xf32>
    %102 = arith.truncf %101 : vector<16x512xf32> to vector<16x512xbf16>
    %c112_63 = arith.constant 112 : index
    %c0_64 = arith.constant 0 : index
    %103 = vector.load %arg8[%c112_63, %c0_64] : memref<144x512xbf16, #tpu.memory_space<vmem>>, vector<16x512xbf16>
    tpu.vector_store %arg8[%c112_63, %c0_64], %102 {strides = array<i32>} : memref<144x512xbf16, #tpu.memory_space<vmem>>, vector<16x512xbf16>,
    %c495_i32_65 = arith.constant 495 : i32
    %104 = tpu.dynamic_rotate %59 by %c495_i32_65 dim 1 : vector<16x512xf32>, i32 -> vector<16x512xf32>
    %c8_66 = arith.constant 8 : index
    %c0_67 = arith.constant 0 : index
    %105 = vector.load %arg2[%c8_66, %c0_67] : memref<9x512xf32, #tpu.memory_space<vmem>>, vector<1x512xf32>
    %106 = vector.broadcast %105 : vector<1x512xf32> to vector<16x512xf32>
    %107 = arith.mulf %104, %106 : vector<16x512xf32>
    %108 = arith.truncf %107 : vector<16x512xf32> to vector<16x512xbf16>
    %c128_68 = arith.constant 128 : index
    %c0_69 = arith.constant 0 : index
    %109 = vector.load %arg8[%c128_68, %c0_69] : memref<144x512xbf16, #tpu.memory_space<vmem>>, vector<16x512xbf16>
    tpu.vector_store %arg8[%c128_68, %c0_69], %108 {strides = array<i32>} : memref<144x512xbf16, #tpu.memory_space<vmem>>, vector<16x512xbf16>,
    %c0_70 = arith.constant 0 : index
    %c0_71 = arith.constant 0 : index
    %110 = vector.load %arg5[%c0_70, %c0_71] : memref<16x144xbf16, #tpu.memory_space<vmem>>, vector<16x144xbf16>
    %c0_72 = arith.constant 0 : index
    %c0_73 = arith.constant 0 : index
    %111 = vector.load %arg8[%c0_72, %c0_73] : memref<144x512xbf16, #tpu.memory_space<vmem>>, vector<144x512xbf16>
    %cst_74 = arith.constant dense<0.000000e+00> : vector<16x512xf32>
    %112 = tpu.matmul %110, %111, %cst_74 {dimension_numbers = #tpu.dot_dimension_numbers<[1], [0], [0], [1], [0, 0, 1, 1], [], []>} : vector<16x144xbf16>, vector<144x512xbf16>, vector<16x512xf32> -> vector<16x512xf32>
    %c0_75 = arith.constant 0 : index
    %c0_76 = arith.constant 0 : index
    %113 = vector.load %arg6[%c0_75, %c0_76] : memref<16x1xf32, #tpu.memory_space<vmem>>, vector<16x1xf32>
    %114 = vector.broadcast %113 : vector<16x1xf32> to vector<16x512xf32>
    %115 = arith.addf %112, %114 : vector<16x512xf32>
    %c0_77 = arith.constant 0 : index
    %c0_78 = arith.constant 0 : index
    %c0_79 = arith.constant 0 : index
    %116 = vector.load %arg1[%c0_77, %c0_78, %c0_79] : memref<1x16x512xf32, #tpu.memory_space<vmem>>, vector<1x16x512xf32>
    %117 = vector.shape_cast %116 : vector<1x16x512xf32> to vector<16x512xf32>
    %118 = arith.addf %115, %117 : vector<16x512xf32>
    %cst_80 = arith.constant 0.000000e+00 : f32
    %119 = vector.broadcast %cst_80 : f32 to vector<16x512xf32>
    %120 = arith.maximumf %118, %119 : vector<16x512xf32>
    %c0_81 = arith.constant 0 : index
    %c0_82 = arith.constant 0 : index
    %c0_83 = arith.constant 0 : index
    %121 = vector.load %arg7[%c0_81, %c0_82, %c0_83] : memref<1x16x512xf32, #tpu.memory_space<vmem>>, vector<1x16x512xf32>
    %122 = vector.shape_cast %121 : vector<1x16x512xf32> to vector<16x512xf32>
    %123 = vector.shape_cast %120 : vector<16x512xf32> to vector<1x16x512xf32>
    tpu.vector_store %arg7[%c0_81, %c0_82, %c0_83], %123 {strides = array<i32>} : memref<1x16x512xf32, #tpu.memory_space<vmem>>, vector<1x16x512xf32>,
    return
  }
  func.func @transform_0(%arg0: i32) -> (i32, i32, i32) {
    %c0_i32 = arith.constant 0 : i32
    %c0_i32_0 = arith.constant 0 : i32
    %c0_i32_1 = arith.constant 0 : i32
    return %arg0, %c0_i32, %c0_i32_0 : i32, i32, i32
  }
  func.func @transform_1(%arg0: i32) -> (i32, i32) {
    %c0_i32 = arith.constant 0 : i32
    %c0_i32_0 = arith.constant 0 : i32
    %c0_i32_1 = arith.constant 0 : i32
    return %c0_i32, %c0_i32_0 : i32, i32
  }
  func.func @transform_2(%arg0: i32) -> (i32, i32) {
    %c0_i32 = arith.constant 0 : i32
    %c0_i32_0 = arith.constant 0 : i32
    %c0_i32_1 = arith.constant 0 : i32
    return %c0_i32, %c0_i32_0 : i32, i32
  }
  func.func @transform_3(%arg0: i32) -> (i32, i32) {
    %c0_i32 = arith.constant 0 : i32
    %c0_i32_0 = arith.constant 0 : i32
    %c0_i32_1 = arith.constant 0 : i32
    return %c0_i32, %c0_i32_0 : i32, i32
  }
  func.func @transform_4(%arg0: i32) -> (i32, i32) {
    %c0_i32 = arith.constant 0 : i32
    %c0_i32_0 = arith.constant 0 : i32
    %c0_i32_1 = arith.constant 0 : i32
    return %c0_i32, %c0_i32_0 : i32, i32
  }
  func.func @transform_5(%arg0: i32) -> (i32, i32) {
    %c0_i32 = arith.constant 0 : i32
    %c0_i32_0 = arith.constant 0 : i32
    %c0_i32_1 = arith.constant 0 : i32
    return %c0_i32, %c0_i32_0 : i32, i32
  }
  func.func @transform_6(%arg0: i32) -> (i32, i32, i32) {
    %c0_i32 = arith.constant 0 : i32
    %c0_i32_0 = arith.constant 0 : i32
    %c0_i32_1 = arith.constant 0 : i32
    return %arg0, %c0_i32, %c0_i32_0 : i32, i32, i32
  }
}

</mosaic_0001>

<bundles_post_ra>
// kernel: basic_block_forward.1
= control target key start
LH: loop header
LB: loop body
LE: loop exit
PB: predicated region body
PF: predicated region fallthrough
CT: control target
= control target key end

     0   :  { %s1437_s25 = smov 17   ;;  %s1438_s14 = smov 16   ;;  %v48_v8 = vlaneseq  ;;  %vm612_vm1 = vcmask 130048   ;;  %v1445_v26 = vmov 0   ;;  %s2397_s0 = inlined_call_operand.vmem [shape: f32[1,16,512], index: 0, kind: input, shape index: {}]   ;;  %s2398_s1 = inlined_call_operand.vmem [shape: f32[9,512], index: 1, kind: input, shape index: {}]   ;;  %s2399_s2 = inlined_call_operand.vmem [shape: bf16[16,144], index: 2, kind: input, shape index: {}]   ;;  %s2400_s3 = inlined_call_operand.vmem [shape: f32[16,1], index: 3, kind: input, shape index: {}]   ;;  %s2401_s4 = inlined_call_operand.vmem [shape: bf16[16,144], index: 4, kind: input, shape index: {}]   ;;  %s2402_s5 = inlined_call_operand.vmem [shape: f32[16,1], index: 5, kind: input, shape index: {}]   ;;  %s2403_s6 = inlined_call_operand.vmem [shape: f32[1,16,512], index: 6, kind: output, shape index: {}]  }
   0x1   :  { %v1484_v0 = vld [vmem:[%s2397_s0 + $0x8] sm:$0xff]  ;;  %v1489_v1 = vld [vmem:[%s2397_s0] sm:$0xff]  ;;  %v1512_v4 = vld [vmem:[%s2397_s0 + $0x30] sm:$0xff]  ;;  %s1439_s15 = smov 15   ;;  %s1440_s16 = smov 1   ;;  %1429 = vset.pattern.permute.xlu0 %v1445_v26  ;;  %1430 = vset.pattern.permute.xlu1 %v1445_v26 }
   0x2   :  { %36 = vrot.lane.b32.xlu1 %v1484_v0, %s1437_s25  ;;  %32 = vrot.lane.b32.xlu0 %v1489_v1, %s1437_s25  ;;  %v1498_v2 = vld [vmem:[%s2397_s0 + $0x28] sm:$0xff]  ;;  %v1503_v3 = vld [vmem:[%s2397_s0 + $0x20] sm:$0xff]  ;;  %s1441_s17 = smov 127   ;;  %s1442_s18 = smov 113   ;;  %v62_v9 = vshrl.u32 %v48_v8, 7  ;;  %v1633_v10 = vand.u32 127, %v48_v8 }
   0x3   :  { %v1517_v5 = vld [vmem:[%s2397_s0 + $0x10] sm:$0xff]  ;;  %v1526_v6 = vld [vmem:[%s2397_s0 + $0x38] sm:$0xff]  ;;  %s1443_s19 = smov 112   ;;  %s1444_s20 = smov 111   ;;  %v1433_v15 = vld [vmem:[%s2399_s2 + $0x4] ss:$8 sps:$4 sm:$0xff]  }
   0x4   :  { %v1531_v7 = vld [vmem:[%s2397_s0 + $0x18] sm:$0xff]  ;;  %v1639_v11 = vsub.s32 1, %v62_v9  ;;  %vm50_vm0 = vcmp.lt.s32.totalorder %v1633_v10, 17  ;;  %1407 = vmatprep.mubr.msk.bf16.mxu0 %vm612_vm1, %v1433_v15  ;;  %1408 = vmatprep.mubr.msk.bf16.mxu1 %vm612_vm1, %v1433_v15  ;;  %v1657_v20 = vsub.s32 2, %v62_v9  ;;  %v1659_v21 = vsub.s32 0, %v62_v9  ;;  %v591_v35 = vld [vmem:[%s2400_s3] sm:$0xff] }
   0x5   :  { %v59_v12 = vld [vmem:[%s2398_s1] ss:$8 sm:$0xf]  ;;  %v1667_v23 = vsub.s32 3, %v62_v9  ;;  %vm113_vm2 = vcmp.lt.s32.totalorder %v1633_v10, 16  ;;  %vm177_vm3 = vcmp.lt.s32.totalorder %v1633_v10, 15 }
   0x6   :  { %38 = vrot.lane.b32.xlu1 %v1498_v2, %s1437_s25  ;;  %34 = vrot.lane.b32.xlu0 %v1503_v3, %s1437_s25  ;;  %v68_v16 = vrot.slane %v59_v12, %v1639_v11  ;;  %v72_v30 = vrot.slane %v59_v12, %v1657_v20  ;;  %v64_v33 = vrot.slane %v59_v12, %v1659_v21  ;;  %v592_v40 = vld [vmem:[%s2400_s3 + $0x8] sm:$0xff]  ;;  %vm241_vm4 = vcmp.lt.s32.totalorder %v1633_v10, 1 }
   0x7   :  { %v76_v34 = vrot.slane %v59_v12, %v1667_v23  ;;  %v1398_v49 = vld [vmem:[%s2398_s1 + $0x1] ss:$8 sm:$0xf]  ;;  %vm313_vm5 = vcmp.lt.s32.totalorder %v1633_v10, 127  ;;  %vm377_vm6 = vcmp.lt.s32.totalorder %v1633_v10, 113  ;;  %vm441_vm7 = vcmp.lt.s32.totalorder %v1633_v10, 112 }
   0x8   :  { %v132_v55 = vrot.slane %v1398_v49, %v1639_v11  ;;  %v136_v62 = vrot.slane %v1398_v49, %v1657_v20  ;;  %v140_v15 = vrot.slane %v1398_v49, %v1667_v23  ;;  %vm505_vm8 = vcmp.lt.s32.totalorder %v1633_v10, 111  ;;  %v1362_v10 = vld [vmem:[%s2397_s0] sm:$0xff] }
   0xa   :  { %42 = vrot.lane.b32.xlu1 %v1512_v4, %s1437_s25  ;;  %40 = vrot.lane.b32.xlu0 %v1517_v5, %s1437_s25 }
   0xe   :  { %46 = vrot.lane.b32.xlu1 %v1526_v6, %s1437_s25  ;;  %44 = vrot.lane.b32.xlu0 %v1531_v7, %s1437_s25 }
  0x12   :  { %99 = vrot.lane.b32.xlu1 %v1503_v3, %s1438_s14  ;;  %97 = vrot.lane.b32.xlu0 %v1489_v1, %s1438_s14 }
  0x16   :  { %103 = vrot.lane.b32.xlu1 %v1498_v2, %s1438_s14  ;;  %101 = vrot.lane.b32.xlu0 %v1484_v0, %s1438_s14 }
  0x1a   :  { %107 = vrot.lane.b32.xlu1 %v1512_v4, %s1438_s14  ;;  %105 = vrot.lane.b32.xlu0 %v1517_v5, %s1438_s14 }
  0x1e   :  { %111 = vrot.lane.b32.xlu1 %v1526_v6, %s1438_s14  ;;  %109 = vrot.lane.b32.xlu0 %v1531_v7, %s1438_s14 }
  0x22   :  { %163 = vrot.lane.b32.xlu1 %v1503_v3, %s1439_s15  ;;  %161 = vrot.lane.b32.xlu0 %v1489_v1, %s1439_s15 }
  0x26   :  { %167 = vrot.lane.b32.xlu1 %v1498_v2, %s1439_s15  ;;  %165 = vrot.lane.b32.xlu0 %v1484_v0, %s1439_s15 }
  0x2a   :  { %171 = vrot.lane.b32.xlu1 %v1512_v4, %s1439_s15  ;;  %169 = vrot.lane.b32.xlu0 %v1517_v5, %s1439_s15 }
  0x2e   :  { %175 = vrot.lane.b32.xlu1 %v1526_v6, %s1439_s15  ;;  %173 = vrot.lane.b32.xlu0 %v1531_v7, %s1439_s15 }
  0x32   :  { %227 = vrot.lane.b32.xlu1 %v1503_v3, %s1440_s16  ;;  %225 = vrot.lane.b32.xlu0 %v1489_v1, %s1440_s16 }
  0x36   :  { %231 = vrot.lane.b32.xlu1 %v1498_v2, %s1440_s16  ;;  %229 = vrot.lane.b32.xlu0 %v1484_v0, %s1440_s16 }
  0x3a   :  { %235 = vrot.lane.b32.xlu1 %v1512_v4, %s1440_s16  ;;  %233 = vrot.lane.b32.xlu0 %v1517_v5, %s1440_s16 }
  0x3e   :  { %239 = vrot.lane.b32.xlu1 %v1526_v6, %s1440_s16  ;;  %237 = vrot.lane.b32.xlu0 %v1531_v7, %s1440_s16 }
  0x42   :  { %299 = vrot.lane.b32.xlu1 %v1503_v3, %s1441_s17  ;;  %297 = vrot.lane.b32.xlu0 %v1489_v1, %s1441_s17 }
  0x46   :  { %303 = vrot.lane.b32.xlu1 %v1498_v2, %s1441_s17  ;;  %301 = vrot.lane.b32.xlu0 %v1484_v0, %s1441_s17 }
  0x4a   :  { %307 = vrot.lane.b32.xlu1 %v1512_v4, %s1441_s17  ;;  %305 = vrot.lane.b32.xlu0 %v1517_v5, %s1441_s17 }
  0x4e   :  { %311 = vrot.lane.b32.xlu1 %v1526_v6, %s1441_s17  ;;  %309 = vrot.lane.b32.xlu0 %v1531_v7, %s1441_s17 }
  0x52   :  { %363 = vrot.lane.b32.xlu1 %v1503_v3, %s1442_s18  ;;  %361 = vrot.lane.b32.xlu0 %v1489_v1, %s1442_s18 }
  0x56   :  { %367 = vrot.lane.b32.xlu1 %v1498_v2, %s1442_s18  ;;  %365 = vrot.lane.b32.xlu0 %v1484_v0, %s1442_s18 }
  0x5a   :  { %371 = vrot.lane.b32.xlu1 %v1512_v4, %s1442_s18  ;;  %369 = vrot.lane.b32.xlu0 %v1517_v5, %s1442_s18 }
  0x5e   :  { %375 = vrot.lane.b32.xlu1 %v1526_v6, %s1442_s18  ;;  %373 = vrot.lane.b32.xlu0 %v1531_v7, %s1442_s18 }
  0x62   :  { %427 = vrot.lane.b32.xlu1 %v1503_v3, %s1443_s19  ;;  %425 = vrot.lane.b32.xlu0 %v1489_v1, %s1443_s19 }
  0x66   :  { %431 = vrot.lane.b32.xlu1 %v1498_v2, %s1443_s19  ;;  %429 = vrot.lane.b32.xlu0 %v1484_v0, %s1443_s19 }
  0x6a   :  { %435 = vrot.lane.b32.xlu1 %v1512_v4, %s1443_s19  ;;  %433 = vrot.lane.b32.xlu0 %v1517_v5, %s1443_s19 }
  0x6e   :  { %439 = vrot.lane.b32.xlu1 %v1526_v6, %s1443_s19  ;;  %437 = vrot.lane.b32.xlu0 %v1531_v7, %s1443_s19 }
  0x72   :  { %491 = vrot.lane.b32.xlu1 %v1503_v3, %s1444_s20  ;;  %489 = vrot.lane.b32.xlu0 %v1489_v1, %s1444_s20 }
  0x74   :  { %v37_v13 = vpop.permute.xlu1 %36  ;;  %v33_v14 = vpop.permute.xlu0 %32 }
  0x75   :  { %v55_v17 = vsel %vm50_vm0, %v33_v14, %v37_v13 }
  0x76   :  { %495 = vrot.lane.b32.xlu1 %v1498_v2, %s1444_s20  ;;  %493 = vrot.lane.b32.xlu0 %v1484_v0, %s1444_s20  ;;  %v82_v24 = vmul.f32 %v68_v16, %v55_v17 }
  0x78   :  { %v39_v18 = vpop.permute.xlu1 %38  ;;  %v35_v19 = vpop.permute.xlu0 %34 }
  0x79   :  { %v56_v22 = vsel %vm50_vm0, %v35_v19, %v39_v18 }
  0x7a   :  { %499 = vrot.lane.b32.xlu1 %v1512_v4, %s1444_s20  ;;  %497 = vrot.lane.b32.xlu0 %v1517_v5, %s1444_s20  ;;  %v86_v25 = vmul.f32 %v68_v16, %v56_v22 }
  0x7c   :  { %v43_v27 = vpop.permute.xlu1 %42  ;;  %v41_v28 = vpop.permute.xlu0 %40  ;;  %v90_v29 = vpack.c.bf16 %v86_v25, %v82_v24 }
  0x7d   :  { %v54_v31 = vsel %vm50_vm0, %v39_v18, %v43_v27  ;;  %v53_v32 = vsel %vm50_vm0, %v37_v13, %v41_v28 }
  0x7e   :  { %503 = vrot.lane.b32.xlu1 %v1526_v6, %s1444_s20  ;;  %501 = vrot.lane.b32.xlu0 %v1531_v7, %s1444_s20  ;;  %v83_v38 = vmul.f32 %v72_v30, %v53_v32  ;;  %v87_v39 = vmul.f32 %v72_v30, %v54_v31  ;;  %v1399_v31 = vld [vmem:[%s2398_s1 + $0x2] ss:$8 sm:$0xf] }
  0x7f   :  { %616 = vmatprep.subr.bf16.mxu0 %v90_v29 }
  0x80   :  { %v47_v36 = vpop.permute.xlu1 %46  ;;  %v45_v37 = vpop.permute.xlu0 %44  ;;  %v91_v54 = vpack.c.bf16 %v87_v39, %v83_v38 }
  0x81   :  { %v58_v41 = vsel %vm50_vm0, %v47_v36, %v35_v19  ;;  %v57_v42 = vsel %vm50_vm0, %v45_v37, %v33_v14  ;;  %v51_v43 = vsel %vm50_vm0, %v41_v28, %v45_v37  ;;  %v52_v44 = vsel %vm50_vm0, %v43_v27, %v47_v36 }
  0x82   :  { %v81_v45 = vmul.f32 %v64_v33, %v57_v42  ;;  %v85_v46 = vmul.f32 %v64_v33, %v58_v41  ;;  %v84_v47 = vmul.f32 %v76_v34, %v51_v43  ;;  %v88_v48 = vmul.f32 %v76_v34, %v52_v44  ;;  %595 = vperm.xlu0 %1429, %v591_v35  }
  0x83   :  { %600 = vperm.xlu1 %1430, %v592_v40   ;;  %v128_v14 = vrot.slane %v1398_v49, %v1659_v21  ;;  %v196_v37 = vrot.slane %v1399_v31, %v1639_v11  ;;  %v200_v44 = vrot.slane %v1399_v31, %v1657_v20 }
  0x84   :  { %v100_v50 = vpop.permute.xlu1 %99  ;;  %v98_v51 = vpop.permute.xlu0 %97  ;;  %v89_v52 = vpack.c.bf16 %v85_v46, %v81_v45  ;;  %v92_v53 = vpack.c.bf16 %v88_v48, %v84_v47 }
  0x86   :  { %617 = vmatpush1.bf16.msra.mxu0 %v89_v52  ;;  %659 = vmatprep.subr.bf16.mxu1 %v92_v53 }
  0x87   :  { %660 = vmatpush1.bf16.msra.mxu1 %v91_v54 }
  0x88   :  { %v104_v56 = vpop.permute.xlu1 %103  ;;  %v102_v57 = vpop.permute.xlu0 %101 }
  0x89   :  { %v119_v58 = vsel %vm113_vm2, %v100_v50, %v104_v56  ;;  %v118_v59 = vsel %vm113_vm2, %v98_v51, %v102_v57 }
  0x8a   :  { %v150_v60 = vmul.f32 %v132_v55, %v119_v58  ;;  %v146_v61 = vmul.f32 %v132_v55, %v118_v59 }
  0x8c   :  { %v108_v63 = vpop.permute.xlu1 %107  ;;  %v106_v8 = vpop.permute.xlu0 %105  ;;  %v154_v9 = vpack.c.bf16 %v150_v60, %v146_v61 }
  0x8d   :  { %v117_v12 = vsel %vm113_vm2, %v104_v56, %v108_v63  ;;  %v116_v13 = vsel %vm113_vm2, %v102_v57, %v106_v8 }
  0x8e   :  { %618 = vmatprep.subr.bf16.mxu0 %v154_v9  ;;  %v151_v16 = vmul.f32 %v136_v62, %v117_v12  ;;  %v147_v17 = vmul.f32 %v136_v62, %v116_v13 }
  0x90   :  { %v112_v18 = vpop.permute.xlu1 %111  ;;  %v110_v19 = vpop.permute.xlu0 %109  ;;  %v155_v36 = vpack.c.bf16 %v151_v16, %v147_v17 }
  0x91   :  { %v115_v22 = vsel %vm113_vm2, %v108_v63, %v112_v18  ;;  %v121_v24 = vsel %vm113_vm2, %v112_v18, %v100_v50  ;;  %v114_v25 = vsel %vm113_vm2, %v106_v8, %v110_v19  ;;  %v120_v26 = vsel %vm113_vm2, %v110_v19, %v98_v51  ;;  %v1400_v8 = vld [vmem:[%s2398_s1 + $0x3] ss:$8 sm:$0xf] }
  0x92   :  { %v149_v27 = vmul.f32 %v128_v14, %v121_v24  ;;  %v152_v28 = vmul.f32 %v140_v15, %v115_v22  ;;  %v145_v29 = vmul.f32 %v128_v14, %v120_v26  ;;  %v148_v30 = vmul.f32 %v140_v15, %v114_v25 }
  0x93   :  { %v192_v50 = vrot.slane %v1399_v31, %v1659_v21  ;;  %v204_v51 = vrot.slane %v1399_v31, %v1667_v23  ;;  %v260_v16 = vrot.slane %v1400_v8, %v1639_v11  ;;  %v264_v26 = vrot.slane %v1400_v8, %v1657_v20 }
  0x94   :  { %v164_v32 = vpop.permute.xlu1 %163  ;;  %v162_v33 = vpop.permute.xlu0 %161  ;;  %v153_v34 = vpack.c.bf16 %v149_v27, %v145_v29  ;;  %v156_v35 = vpack.c.bf16 %v152_v28, %v148_v30 }
  0x96   :  { %619 = vmatpush1.bf16.msra.mxu0 %v153_v34  ;;  %661 = vmatprep.subr.bf16.mxu1 %v156_v35 }
  0x97   :  { %662 = vmatpush1.bf16.msra.mxu1 %v155_v36 }
  0x98   :  { %v168_v38 = vpop.permute.xlu1 %167  ;;  %v166_v39 = vpop.permute.xlu0 %165 }
  0x99   :  { %v183_v40 = vsel %vm177_vm3, %v164_v32, %v168_v38  ;;  %v182_v41 = vsel %vm177_vm3, %v162_v33, %v166_v39 }
  0x9a   :  { %v214_v42 = vmul.f32 %v196_v37, %v183_v40  ;;  %v210_v43 = vmul.f32 %v196_v37, %v182_v41 }
  0x9c   :  { %v172_v45 = vpop.permute.xlu1 %171  ;;  %v170_v46 = vpop.permute.xlu0 %169  ;;  %v218_v47 = vpack.c.bf16 %v214_v42, %v210_v43 }
  0x9d   :  { %v181_v48 = vsel %vm177_vm3, %v168_v38, %v172_v45  ;;  %v180_v49 = vsel %vm177_vm3, %v166_v39, %v170_v46 }
  0x9e   :  { %620 = vmatprep.subr.bf16.mxu0 %v218_v47  ;;  %v215_v52 = vmul.f32 %v200_v44, %v181_v48  ;;  %v211_v53 = vmul.f32 %v200_v44, %v180_v49 }
  0xa0   :  { %v176_v54 = vpop.permute.xlu1 %175  ;;  %v174_v55 = vpop.permute.xlu0 %173  ;;  %v219_v15 = vpack.c.bf16 %v215_v52, %v211_v53  ;;  %v1401_v53 = vld [vmem:[%s2398_s1 + $0x5] ss:$8 sm:$0xf] }
  0xa1   :  { %v179_v56 = vsel %vm177_vm3, %v172_v45, %v176_v54  ;;  %v185_v57 = vsel %vm177_vm3, %v176_v54, %v164_v32  ;;  %v178_v58 = vsel %vm177_vm3, %v170_v46, %v174_v55  ;;  %v184_v59 = vsel %vm177_vm3, %v174_v55, %v162_v33 }
  0xa2   :  { %v213_v60 = vmul.f32 %v192_v50, %v185_v57  ;;  %v216_v61 = vmul.f32 %v204_v51, %v179_v56  ;;  %v209_v62 = vmul.f32 %v192_v50, %v184_v59  ;;  %v212_v63 = vmul.f32 %v204_v51, %v178_v58 }
  0xa3   :  { %v256_v32 = vrot.slane %v1400_v8, %v1659_v21  ;;  %v268_v33 = vrot.slane %v1400_v8, %v1667_v23  ;;  %v290_v46 = vpack.c.bf16 %v1498_v2, %v1484_v0  ;;  %v292_v51 = vpack.c.bf16 %v1526_v6, %v1531_v7 }
  0xa4   :  { %v228_v9 = vpop.permute.xlu1 %227  ;;  %v226_v12 = vpop.permute.xlu0 %225  ;;  %v217_v13 = vpack.c.bf16 %v213_v60, %v209_v62  ;;  %v220_v14 = vpack.c.bf16 %v216_v61, %v212_v63  ;;  %v289_v54 = vpack.c.bf16 %v1503_v3, %v1489_v1  ;;  %v291_v0 = vpack.c.bf16 %v1512_v4, %v1517_v5 }
  0xa5   :  { %v328_v2 = vrot.slane %v1401_v53, %v1659_v21  ;;  %v332_v57 = vrot.slane %v1401_v53, %v1639_v11  ;;  %v336_v62 = vrot.slane %v1401_v53, %v1657_v20  ;;  %v340_v63 = vrot.slane %v1401_v53, %v1667_v23 }
  0xa6   :  { %621 = vmatpush1.bf16.msra.mxu0 %v217_v13  ;;  %663 = vmatprep.subr.bf16.mxu1 %v220_v14 }
  0xa7   :  { %664 = vmatpush1.bf16.msra.mxu1 %v219_v15 }
  0xa8   :  { %v232_v17 = vpop.permute.xlu1 %231  ;;  %v230_v18 = vpop.permute.xlu0 %229 }
  0xa9   :  { %v247_v19 = vsel %vm241_vm4, %v228_v9, %v232_v17  ;;  %v246_v22 = vsel %vm241_vm4, %v226_v12, %v230_v18 }
  0xaa   :  { %v278_v24 = vmul.f32 %v260_v16, %v247_v19  ;;  %v274_v25 = vmul.f32 %v260_v16, %v246_v22 }
  0xac   :  { %v236_v27 = vpop.permute.xlu1 %235  ;;  %v234_v28 = vpop.permute.xlu0 %233  ;;  %v282_v29 = vpack.c.bf16 %v278_v24, %v274_v25 }
  0xad   :  { %v245_v30 = vsel %vm241_vm4, %v232_v17, %v236_v27  ;;  %v244_v31 = vsel %vm241_vm4, %v230_v18, %v234_v28 }
  0xae   :  { %622 = vmatprep.subr.bf16.mxu0 %v282_v29  ;;  %v279_v34 = vmul.f32 %v264_v26, %v245_v30  ;;  %v275_v35 = vmul.f32 %v264_v26, %v244_v31  ;;  %v1402_v29 = vld [vmem:[%s2398_s1 + $0x6] ss:$8 sm:$0xf] }
  0xaf   :  { %v392_v30 = vrot.slane %v1402_v29, %v1659_v21 }
  0xb0   :  { %v240_v36 = vpop.permute.xlu1 %239  ;;  %v238_v37 = vpop.permute.xlu0 %237  ;;  %v283_v52 = vpack.c.bf16 %v279_v34, %v275_v35  ;;  %v396_v35 = vrot.slane %v1402_v29, %v1639_v11 }
  0xb1   :  { %v243_v38 = vsel %vm241_vm4, %v236_v27, %v240_v36  ;;  %v249_v39 = vsel %vm241_vm4, %v240_v36, %v228_v9  ;;  %v242_v40 = vsel %vm241_vm4, %v234_v28, %v238_v37  ;;  %v248_v41 = vsel %vm241_vm4, %v238_v37, %v226_v12 }
  0xb2   :  { %v277_v42 = vmul.f32 %v256_v32, %v249_v39  ;;  %v280_v43 = vmul.f32 %v268_v33, %v243_v38  ;;  %v273_v44 = vmul.f32 %v256_v32, %v248_v41  ;;  %v276_v45 = vmul.f32 %v268_v33, %v242_v40 }
  0xb4   :  { %v300_v47 = vpop.permute.xlu1 %299  ;;  %v298_v48 = vpop.permute.xlu0 %297  ;;  %v281_v49 = vpack.c.bf16 %v277_v42, %v273_v44  ;;  %v284_v50 = vpack.c.bf16 %v280_v43, %v276_v45  ;;  %v400_v44 = vrot.slane %v1402_v29, %v1657_v20  ;;  %v404_v45 = vrot.slane %v1402_v29, %v1667_v23 }
  0xb6   :  { %623 = vmatpush1.bf16.msra.mxu0 %v281_v49  ;;  %665 = vmatprep.subr.bf16.mxu1 %v284_v50 }
  0xb7   :  { %666 = vmatpush1.bf16.msra.mxu1 %v283_v52  ;;  %624 = vmatprep.subr.bf16.mxu0 %v290_v46 }
  0xb8   :  { %v304_v6 = vpop.permute.xlu1 %303  ;;  %v302_v7 = vpop.permute.xlu0 %301  ;;  %667 = vmatprep.subr.bf16.mxu1 %v292_v51 }
  0xb9   :  { %v319_v55 = vsel %vm313_vm5, %v300_v47, %v304_v6  ;;  %v318_v56 = vsel %vm313_vm5, %v298_v48, %v302_v7 }
  0xba   :  { %625 = vmatpush1.bf16.msra.mxu0 %v289_v54  ;;  %v349_v1 = vmul.f32 %v328_v2, %v319_v55  ;;  %v345_v3 = vmul.f32 %v328_v2, %v318_v56 }
  0xbb   :  { %668 = vmatpush1.bf16.msra.mxu1 %v291_v0 }
  0xbc   :  { %v308_v58 = vpop.permute.xlu1 %307  ;;  %v306_v59 = vpop.permute.xlu0 %305  ;;  %v353_v13 = vpack.c.bf16 %v349_v1, %v345_v3  ;;  %v1403_v1 = vld [vmem:[%s2398_s1 + $0x7] ss:$8 sm:$0xf] }
  0xbd   :  { %v317_v4 = vsel %vm313_vm5, %v304_v6, %v308_v58  ;;  %v316_v5 = vsel %vm313_vm5, %v302_v7, %v306_v59  ;;  %v456_v3 = vrot.slane %v1403_v1, %v1659_v21 }
  0xbe   :  { %v350_v60 = vmul.f32 %v332_v57, %v317_v4  ;;  %v346_v61 = vmul.f32 %v332_v57, %v316_v5 }
  0xc0   :  { %v312_v8 = vpop.permute.xlu1 %311  ;;  %v310_v9 = vpop.permute.xlu0 %309  ;;  %v354_v12 = vpack.c.bf16 %v350_v60, %v346_v61  ;;  %v460_v60 = vrot.slane %v1403_v1, %v1639_v11 }
  0xc1   :  { %v315_v14 = vsel %vm313_vm5, %v308_v58, %v312_v8  ;;  %v321_v15 = vsel %vm313_vm5, %v312_v8, %v300_v47  ;;  %v314_v16 = vsel %vm313_vm5, %v306_v59, %v310_v9  ;;  %v320_v17 = vsel %vm313_vm5, %v310_v9, %v298_v48 }
  0xc2   :  { %v351_v18 = vmul.f32 %v336_v62, %v315_v14  ;;  %v352_v19 = vmul.f32 %v340_v63, %v321_v15  ;;  %v347_v22 = vmul.f32 %v336_v62, %v314_v16  ;;  %v348_v24 = vmul.f32 %v340_v63, %v320_v17  ;;  %626 = vmatprep.subr.bf16.mxu0 %v354_v12 }
  0xc3   :  { %627 = vmatpush1.bf16.msra.mxu0 %v353_v13  ;;  %v464_v15 = vrot.slane %v1403_v1, %v1657_v20  ;;  %v468_v16 = vrot.slane %v1403_v1, %v1667_v23 }
  0xc4   :  { %v364_v25 = vpop.permute.xlu1 %363  ;;  %v362_v26 = vpop.permute.xlu0 %361  ;;  %v356_v27 = vpack.c.bf16 %v352_v19, %v348_v24  ;;  %v355_v28 = vpack.c.bf16 %v351_v18, %v347_v22 }
  0xc6   :  { %669 = vmatprep.subr.bf16.mxu1 %v356_v27 }
  0xc7   :  { %670 = vmatpush1.bf16.msra.mxu1 %v355_v28 }
  0xc8   :  { %v368_v31 = vpop.permute.xlu1 %367  ;;  %v366_v32 = vpop.permute.xlu0 %365 }
  0xc9   :  { %v383_v33 = vsel %vm377_vm6, %v364_v25, %v368_v31  ;;  %v382_v34 = vsel %vm377_vm6, %v362_v26, %v366_v32 }
  0xca   :  { %v413_v36 = vmul.f32 %v392_v30, %v383_v33  ;;  %v409_v37 = vmul.f32 %v392_v30, %v382_v34 }
  0xcc   :  { %v372_v38 = vpop.permute.xlu1 %371  ;;  %v370_v39 = vpop.permute.xlu0 %369  ;;  %v417_v49 = vpack.c.bf16 %v413_v36, %v409_v37  ;;  %v1404_v36 = vld [vmem:[%s2398_s1 + $0x20] ss:$8 sm:$0xf] }
  0xcd   :  { %v381_v40 = vsel %vm377_vm6, %v368_v31, %v372_v38  ;;  %v380_v41 = vsel %vm377_vm6, %v366_v32, %v370_v39  ;;  %v520_v37 = vrot.slane %v1404_v36, %v1659_v21 }
  0xce   :  { %v414_v42 = vmul.f32 %v396_v35, %v381_v40  ;;  %v410_v43 = vmul.f32 %v396_v35, %v380_v41 }
  0xd0   :  { %v376_v46 = vpop.permute.xlu1 %375  ;;  %v374_v47 = vpop.permute.xlu0 %373  ;;  %v418_v48 = vpack.c.bf16 %v414_v42, %v410_v43  ;;  %v524_v42 = vrot.slane %v1404_v36, %v1639_v11 }
  0xd1   :  { %v379_v50 = vsel %vm377_vm6, %v372_v38, %v376_v46  ;;  %v385_v51 = vsel %vm377_vm6, %v376_v46, %v364_v25  ;;  %v378_v52 = vsel %vm377_vm6, %v370_v39, %v374_v47  ;;  %v384_v53 = vsel %vm377_vm6, %v374_v47, %v362_v26 }
  0xd2   :  { %v415_v54 = vmul.f32 %v400_v44, %v379_v50  ;;  %v416_v0 = vmul.f32 %v404_v45, %v385_v51  ;;  %v411_v2 = vmul.f32 %v400_v44, %v378_v52  ;;  %v412_v6 = vmul.f32 %v404_v45, %v384_v53  ;;  %628 = vmatprep.subr.bf16.mxu0 %v418_v48 }
  0xd3   :  { %629 = vmatpush1.bf16.msra.mxu0 %v417_v49  ;;  %v528_v51 = vrot.slane %v1404_v36, %v1657_v20  ;;  %v532_v52 = vrot.slane %v1404_v36, %v1667_v23 }
  0xd4   :  { %v428_v7 = vpop.permute.xlu1 %427  ;;  %v426_v55 = vpop.permute.xlu0 %425  ;;  %v420_v56 = vpack.c.bf16 %v416_v0, %v412_v6  ;;  %v419_v57 = vpack.c.bf16 %v415_v54, %v411_v2 }
  0xd6   :  { %671 = vmatprep.subr.bf16.mxu1 %v420_v56 }
  0xd7   :  { %672 = vmatpush1.bf16.msra.mxu1 %v419_v57 }
  0xd8   :  { %v432_v58 = vpop.permute.xlu1 %431  ;;  %v430_v59 = vpop.permute.xlu0 %429 }
  0xd9   :  { %v447_v4 = vsel %vm441_vm7, %v428_v7, %v432_v58  ;;  %v446_v5 = vsel %vm441_vm7, %v426_v55, %v430_v59 }
  0xda   :  { %v477_v61 = vmul.f32 %v456_v3, %v447_v4  ;;  %v473_v62 = vmul.f32 %v456_v3, %v446_v5 }
  0xdc   :  { %v436_v63 = vpop.permute.xlu1 %435  ;;  %v434_v8 = vpop.permute.xlu0 %433  ;;  %v481_v22 = vpack.c.bf16 %v477_v61, %v473_v62 }
  0xdd   :  { %v445_v9 = vsel %vm441_vm7, %v432_v58, %v436_v63  ;;  %v444_v12 = vsel %vm441_vm7, %v430_v59, %v434_v8  ;;  %v1431_v59 = vld [vmem:[%s2399_s2] ss:$8 sps:$4 sm:$0xff]  }
  0xde   :  { %v478_v13 = vmul.f32 %v460_v60, %v445_v9  ;;  %v474_v14 = vmul.f32 %v460_v60, %v444_v12 }
  0xe0   :  { %v440_v17 = vpop.permute.xlu1 %439  ;;  %v438_v18 = vpop.permute.xlu0 %437  ;;  %v482_v19 = vpack.c.bf16 %v478_v13, %v474_v14 }
  0xe1   :  { %v443_v24 = vsel %vm441_vm7, %v436_v63, %v440_v17  ;;  %v449_v25 = vsel %vm441_vm7, %v440_v17, %v428_v7  ;;  %v442_v26 = vsel %vm441_vm7, %v434_v8, %v438_v18  ;;  %v448_v27 = vsel %vm441_vm7, %v438_v18, %v426_v55 }
  0xe2   :  { %v479_v28 = vmul.f32 %v464_v15, %v443_v24  ;;  %v480_v29 = vmul.f32 %v468_v16, %v449_v25  ;;  %v475_v30 = vmul.f32 %v464_v15, %v442_v26  ;;  %v476_v31 = vmul.f32 %v468_v16, %v448_v27  ;;  %630 = vmatprep.subr.bf16.mxu0 %v482_v19 }
  0xe3   :  { %631 = vmatpush1.bf16.msra.mxu0 %v481_v22 }
  0xe4   :  { %v492_v32 = vpop.permute.xlu1 %491  ;;  %v490_v33 = vpop.permute.xlu0 %489  ;;  %v484_v34 = vpack.c.bf16 %v480_v29, %v476_v31  ;;  %v483_v35 = vpack.c.bf16 %v479_v28, %v475_v30 }
  0xe6   :  { %673 = vmatprep.subr.bf16.mxu1 %v484_v34 }
  0xe7   :  { %674 = vmatpush1.bf16.msra.mxu1 %v483_v35 }
  0xe8   :  { %v496_v38 = vpop.permute.xlu1 %495  ;;  %v494_v39 = vpop.permute.xlu0 %493 }
  0xe9   :  { %v511_v40 = vsel %vm505_vm8, %v492_v32, %v496_v38  ;;  %v510_v41 = vsel %vm505_vm8, %v490_v33, %v494_v39 }
  0xea   :  { %v541_v43 = vmul.f32 %v520_v37, %v511_v40  ;;  %v537_v44 = vmul.f32 %v520_v37, %v510_v41 }
  0xec   :  { %v500_v45 = vpop.permute.xlu1 %499  ;;  %v498_v46 = vpop.permute.xlu0 %497  ;;  %v545_v2 = vpack.c.bf16 %v541_v43, %v537_v44  ;;  %v1252_v44 = vld [vmem:[%s2402_s5] sm:$0xff] }
  0xed   :  { %v509_v47 = vsel %vm505_vm8, %v496_v38, %v500_v45  ;;  %v508_v48 = vsel %vm505_vm8, %v494_v39, %v498_v46  ;;  %v1434_v39 = vld [vmem:[%s2401_s4 + $0x4] ss:$8 sps:$4 sm:$0xff]  }
  0xee   :  { %v542_v49 = vmul.f32 %v524_v42, %v509_v47  ;;  %v538_v50 = vmul.f32 %v524_v42, %v508_v48 }
  0xf0   :  { %v504_v53 = vpop.permute.xlu1 %503  ;;  %v502_v54 = vpop.permute.xlu0 %501  ;;  %v546_v0 = vpack.c.bf16 %v542_v49, %v538_v50 }
  0xf1   :  { %v507_v6 = vsel %vm505_vm8, %v500_v45, %v504_v53  ;;  %v513_v7 = vsel %vm505_vm8, %v504_v53, %v492_v32  ;;  %v506_v55 = vsel %vm505_vm8, %v498_v46, %v502_v54  ;;  %v512_v56 = vsel %vm505_vm8, %v502_v54, %v490_v33  ;;  %v1253_v46 = vld [vmem:[%s2402_s5 + $0x8] sm:$0xff] }
  0xf2   :  { %v543_v57 = vmul.f32 %v528_v51, %v507_v6  ;;  %v544_v1 = vmul.f32 %v532_v52, %v513_v7  ;;  %v539_v3 = vmul.f32 %v528_v51, %v506_v55  ;;  %v540_v58 = vmul.f32 %v532_v52, %v512_v56  ;;  %632 = vmatprep.subr.bf16.mxu0 %v546_v0 }
  0xf3   :  { %633 = vmatpush1.bf16.msra.mxu0 %v545_v2 }
  0xf4   :  { %v548_v4 = vpack.c.bf16 %v544_v1, %v540_v58  ;;  %v547_v5 = vpack.c.bf16 %v543_v57, %v539_v3 }
  0xf6   :  { %649 = vmatmul.mubr.bf16.vlgmr.msra.gmra.mrb[0].mxu0 %v1431_v59  ;;  %675 = vmatprep.subr.bf16.mxu1 %v548_v4 }
  0xf7   :  { %676 = vmatpush1.bf16.msra.mxu1 %v547_v5  ;;  %1418 = vmatprep.mubr.msk.bf16.mxu0 %vm612_vm1, %v1434_v39 }
  0xfa   :  { %692 = vmatmul.mubr.bf16.vlgmr.msra.gmra.mrb[0].mxu1 %v1431_v59 }
  0xfb   :  { %1419 = vmatprep.mubr.msk.bf16.mxu1 %vm612_vm1, %v1434_v39 }
 0x101   :  { %v596_v60 = vpop.permute.xlu0 %595 }
 0x102   :  { %v601_v62 = vpop.permute.xlu1 %600 }
 0x1c9   :  { %v650_v61 = vpop.f32.mrb[0].mxu0 }
 0x1ca   :  { %v651_v63 = vadd.f32 %v650_v61, %v596_v60  ;;  %v652_v8 = vpop.f32.mrb[1].mxu0 }
 0x1cb   :  { %v654_v9 = vpop.f32.mrb[2].mxu0  ;;  %v653_v29 = vadd.f32 %v652_v8, %v596_v60 }
 0x1cc   :  { %v1873_v12 = vmax.f32 %v651_v63, 0.0  ;;  %v655_v13 = vadd.f32 %v654_v9, %v601_v62  ;;  %v656_v14 = vpop.f32.mrb[3].mxu0  ;;  %v734_v63 = vld [vmem:[%s2398_s1] ss:$8 sm:$0xf] }
 0x1cd   :  { %v693_v15 = vpop.f32.mrb[0].mxu1  ;;  %v657_v30 = vadd.f32 %v656_v14, %v601_v62  ;;  %v1947_v31 = vmax.f32 %v653_v29, 0.0  ;;  %v743_v9 = vrot.slane %v734_v63, %v1639_v11  ;;  %v751_v29 = vrot.slane %v734_v63, %v1667_v23 }
 0x1ce   :  { %v1875_v16 = vmax.f32 %v655_v13, 0.0  ;;  %v694_v17 = vadd.f32 %v693_v15, %v596_v60  ;;  %v695_v18 = vpop.f32.mrb[1].mxu1  ;;  %710 = vrot.lane.b32.xlu1 %v1873_v12, %s1437_s25  ;;  %v747_v13 = vrot.slane %v734_v63, %v1657_v20 }
 0x1cf   :  { %v697_v19 = vpop.f32.mrb[2].mxu1  ;;  %v696_v32 = vadd.f32 %v695_v18, %v596_v60  ;;  %v1951_v33 = vmax.f32 %v657_v30, 0.0 }
 0x1d0   :  { %v1879_v22 = vmax.f32 %v694_v17, 0.0  ;;  %v698_v24 = vadd.f32 %v697_v19, %v601_v62  ;;  %v699_v25 = vpop.f32.mrb[3].mxu1  ;;  %712 = vrot.lane.b32.xlu0 %v1875_v16, %s1437_s25 }
 0x1d1   :  { %v700_v34 = vadd.f32 %v699_v25, %v601_v62  ;;  %v1955_v35 = vmax.f32 %v696_v32, 0.0  ;;  %v739_v25 = vrot.slane %v734_v63, %v1659_v21 }
 0x1d2   :  { %v1885_v27 = vmax.f32 %v698_v24, 0.0  ;;  %718 = vrot.lane.b32.xlu1 %v1879_v22, %s1437_s25 }
 0x1d3   :  { %v1959_v36 = vmax.f32 %v700_v34, 0.0 }
 0x1d4   :  { %720 = vrot.lane.b32.xlu0 %v1885_v27, %s1437_s25 }
 0x1d6   :  { %772 = vrot.lane.b32.xlu1 %v1873_v12, %s1438_s14 }
 0x1d8   :  { %774 = vrot.lane.b32.xlu0 %v1875_v16, %s1438_s14 }
 0x1da   :  { %780 = vrot.lane.b32.xlu1 %v1879_v22, %s1438_s14 }
 0x1dc   :  { %782 = vrot.lane.b32.xlu0 %v1885_v27, %s1438_s14 }
 0x1de   :  { %834 = vrot.lane.b32.xlu1 %v1873_v12, %s1439_s15 }
 0x1e0   :  { %836 = vrot.lane.b32.xlu0 %v1875_v16, %s1439_s15 }
 0x1e2   :  { %842 = vrot.lane.b32.xlu1 %v1879_v22, %s1439_s15 }
 0x1e4   :  { %844 = vrot.lane.b32.xlu0 %v1885_v27, %s1439_s15 }
 0x1e6   :  { %896 = vrot.lane.b32.xlu1 %v1873_v12, %s1440_s16 }
 0x1e8   :  { %898 = vrot.lane.b32.xlu0 %v1875_v16, %s1440_s16 }
 0x1ea   :  { %904 = vrot.lane.b32.xlu1 %v1879_v22, %s1440_s16 }
 0x1ec   :  { %906 = vrot.lane.b32.xlu0 %v1885_v27, %s1440_s16 }
 0x1ee   :  { %966 = vrot.lane.b32.xlu1 %v1873_v12, %s1441_s17 }
 0x1f0   :  { %968 = vrot.lane.b32.xlu0 %v1875_v16, %s1441_s17 }
 0x1f2   :  { %974 = vrot.lane.b32.xlu1 %v1879_v22, %s1441_s17 }
 0x1f4   :  { %976 = vrot.lane.b32.xlu0 %v1885_v27, %s1441_s17 }
 0x1f6   :  { %1028 = vrot.lane.b32.xlu1 %v1873_v12, %s1442_s18 }
 0x1f8   :  { %1030 = vrot.lane.b32.xlu0 %v1875_v16, %s1442_s18 }
 0x1fa   :  { %1036 = vrot.lane.b32.xlu1 %v1879_v22, %s1442_s18 }
 0x1fc   :  { %1038 = vrot.lane.b32.xlu0 %v1885_v27, %s1442_s18 }
 0x1fe   :  { %1090 = vrot.lane.b32.xlu1 %v1873_v12, %s1443_s19 }
 0x200   :  { %1092 = vrot.lane.b32.xlu0 %v1875_v16, %s1443_s19 }
 0x202   :  { %1098 = vrot.lane.b32.xlu1 %v1879_v22, %s1443_s19 }
 0x204   :  { %1100 = vrot.lane.b32.xlu0 %v1885_v27, %s1443_s19 }
 0x206   :  { %1152 = vrot.lane.b32.xlu1 %v1873_v12, %s1444_s20 }
 0x208   :  { %1154 = vrot.lane.b32.xlu0 %v1875_v16, %s1444_s20 }
 0x20a   :  { %1160 = vrot.lane.b32.xlu1 %v1879_v22, %s1444_s20 }
 0x20c   :  { %1162 = vrot.lane.b32.xlu0 %v1885_v27, %s1444_s20 }
 0x20e   :  { %714 = vrot.lane.b32.xlu1 %v1947_v31, %s1437_s25 }
 0x210   :  { %716 = vrot.lane.b32.xlu0 %v1951_v33, %s1437_s25 }
 0x212   :  { %722 = vrot.lane.b32.xlu1 %v1955_v35, %s1437_s25 }
 0x214   :  { %724 = vrot.lane.b32.xlu0 %v1959_v36, %s1437_s25 }
 0x216   :  { %776 = vrot.lane.b32.xlu1 %v1947_v31, %s1438_s14 }
 0x218   :  { %778 = vrot.lane.b32.xlu0 %v1951_v33, %s1438_s14 }
 0x21a   :  { %784 = vrot.lane.b32.xlu1 %v1955_v35, %s1438_s14 }
 0x21c   :  { %786 = vrot.lane.b32.xlu0 %v1959_v36, %s1438_s14 }
 0x21e   :  { %838 = vrot.lane.b32.xlu1 %v1947_v31, %s1439_s15 }
 0x220   :  { %840 = vrot.lane.b32.xlu0 %v1951_v33, %s1439_s15 }
 0x222   :  { %846 = vrot.lane.b32.xlu1 %v1955_v35, %s1439_s15 }
 0x224   :  { %848 = vrot.lane.b32.xlu0 %v1959_v36, %s1439_s15 }
 0x226   :  { %900 = vrot.lane.b32.xlu1 %v1947_v31, %s1440_s16 }
 0x228   :  { %902 = vrot.lane.b32.xlu0 %v1951_v33, %s1440_s16 }
 0x22a   :  { %908 = vrot.lane.b32.xlu1 %v1955_v35, %s1440_s16 }
 0x22c   :  { %910 = vrot.lane.b32.xlu0 %v1959_v36, %s1440_s16 }
 0x22e   :  { %970 = vrot.lane.b32.xlu1 %v1947_v31, %s1441_s17 }
 0x230   :  { %972 = vrot.lane.b32.xlu0 %v1951_v33, %s1441_s17 }
 0x232   :  { %978 = vrot.lane.b32.xlu1 %v1955_v35, %s1441_s17 }
 0x234   :  { %980 = vrot.lane.b32.xlu0 %v1959_v36, %s1441_s17 }
 0x236   :  { %1032 = vrot.lane.b32.xlu1 %v1947_v31, %s1442_s18 }
 0x238   :  { %1034 = vrot.lane.b32.xlu0 %v1951_v33, %s1442_s18 }
 0x23a   :  { %1040 = vrot.lane.b32.xlu1 %v1955_v35, %s1442_s18 }
 0x23c   :  { %1042 = vrot.lane.b32.xlu0 %v1959_v36, %s1442_s18 }
 0x23e   :  { %1094 = vrot.lane.b32.xlu1 %v1947_v31, %s1443_s19 }
 0x240   :  { %1096 = vrot.lane.b32.xlu0 %v1951_v33, %s1443_s19  ;;  %v2009_v37 = vpop.permute.xlu1 %710 }
 0x242   :  { %v2011_v38 = vpop.permute.xlu0 %712  ;;  %1102 = vrot.lane.b32.xlu1 %v1955_v35, %s1443_s19 }
 0x244   :  { %1104 = vrot.lane.b32.xlu0 %v1959_v36, %s1443_s19  ;;  %v719_v40 = vpop.permute.xlu1 %718 }
 0x246   :  { %v721_v41 = vpop.permute.xlu0 %720  ;;  %1156 = vrot.lane.b32.xlu1 %v1947_v31, %s1444_s20 }
 0x248   :  { %1158 = vrot.lane.b32.xlu0 %v1951_v33, %s1444_s20  ;;  %v2026_v42 = vpop.permute.xlu1 %772 }
 0x24a   :  { %v2028_v43 = vpop.permute.xlu0 %774  ;;  %1164 = vrot.lane.b32.xlu1 %v1955_v35, %s1444_s20 }
 0x24c   :  { %1166 = vrot.lane.b32.xlu0 %v1959_v36, %s1444_s20  ;;  %v2037_v45 = vpop.permute.xlu1 %780 }
 0x24e   :  { %v2042_v47 = vpop.permute.xlu0 %782  ;;  %1256 = vperm.xlu1 %1430, %v1252_v44  }
 0x250   :  { %1261 = vperm.xlu0 %1429, %v1253_v46   ;;  %v2044_v48 = vpop.permute.xlu1 %834  ;;  %v1409_v46 = vld [vmem:[%s2398_s1 + $0x1] ss:$8 sm:$0xf] }
 0x252   :  { %v2046_v49 = vpop.permute.xlu0 %836 }
 0x254   :  { %v2048_v50 = vpop.permute.xlu1 %842 }
 0x256   :  { %v2050_v51 = vpop.permute.xlu0 %844 }
 0x258   :  { %v2052_v52 = vpop.permute.xlu1 %896 }
 0x25a   :  { %v2054_v53 = vpop.permute.xlu0 %898 }
 0x25c   :  { %v2056_v54 = vpop.permute.xlu1 %904 }
 0x25e   :  { %v2058_v0 = vpop.permute.xlu0 %906 }
 0x260   :  { %v2060_v2 = vpop.permute.xlu1 %966 }
 0x262   :  { %v2062_v6 = vpop.permute.xlu0 %968 }
 0x264   :  { %v2064_v7 = vpop.permute.xlu1 %974 }
 0x266   :  { %v2066_v55 = vpop.permute.xlu0 %976 }
 0x268   :  { %v2068_v56 = vpop.permute.xlu1 %1028 }
 0x26a   :  { %v2070_v57 = vpop.permute.xlu0 %1030 }
 0x26c   :  { %v2072_v1 = vpop.permute.xlu1 %1036 }
 0x26e   :  { %v2074_v3 = vpop.permute.xlu0 %1038 }
 0x270   :  { %v2076_v58 = vpop.permute.xlu1 %1090 }
 0x272   :  { %v2078_v59 = vpop.permute.xlu0 %1092 }
 0x274   :  { %v2080_v4 = vpop.permute.xlu1 %1098 }
 0x276   :  { %v2082_v5 = vpop.permute.xlu0 %1100 }
 0x278   :  { %v2084_v60 = vpop.permute.xlu1 %1152 }
 0x27a   :  { %v2086_v61 = vpop.permute.xlu0 %1154 }
 0x27b   :  { %2405 = vst [vmem:[#allocation3_spill] sm:$0xff] %v2086_v61 }
 0x27c   :  { %v2088_v62 = vpop.permute.xlu1 %1160 }
 0x27e   :  { %v2093_v8 = vpop.permute.xlu0 %1162 }
 0x280   :  { %v715_v14 = vpop.permute.xlu1 %714 }
 0x281   :  { %v728_v15 = vsel %vm50_vm0, %v715_v14, %v719_v40  ;;  %v730_v17 = vsel %vm50_vm0, %v2009_v37, %v715_v14 }
 0x282   :  { %v717_v18 = vpop.permute.xlu0 %716  ;;  %v757_v30 = vmul.f32 %v743_v9, %v730_v17  ;;  %v758_v32 = vmul.f32 %v747_v13, %v728_v15  ;;  %v809_v15 = vrot.slane %v1409_v46, %v1657_v20 }
 0x283   :  { %v729_v19 = vsel %vm50_vm0, %v717_v18, %v721_v41  ;;  %v731_v24 = vsel %vm50_vm0, %v2011_v38, %v717_v18 }
 0x284   :  { %v761_v34 = vmul.f32 %v743_v9, %v731_v24  ;;  %v762_v39 = vmul.f32 %v747_v13, %v729_v19  ;;  %v723_v44 = vpop.permute.xlu1 %722  ;;  %v805_v13 = vrot.slane %v1409_v46, %v1639_v11 }
 0x285   :  { %v726_v14 = vsel %vm50_vm0, %v719_v40, %v723_v44  ;;  %v732_v18 = vsel %vm50_vm0, %v723_v44, %v2009_v37 }
 0x286   :  { %v766_v28 = vpack.c.bf16 %v762_v39, %v758_v32  ;;  %v725_v26 = vpop.permute.xlu0 %724  ;;  %v765_v61 = vpack.c.bf16 %v761_v34, %v757_v30  ;;  %v756_v17 = vmul.f32 %v739_v25, %v732_v18  ;;  %v759_v40 = vmul.f32 %v751_v29, %v726_v14 }
 0x287   :  { %v727_v63 = vsel %vm50_vm0, %v721_v41, %v725_v26  ;;  %v733_v9 = vsel %vm50_vm0, %v725_v26, %v2011_v38  ;;  %v801_v34 = vrot.slane %v1409_v46, %v1659_v21 }
 0x288   :  { %v760_v19 = vmul.f32 %v739_v25, %v733_v9  ;;  %v763_v24 = vmul.f32 %v751_v29, %v727_v63  ;;  %1276 = vmatprep.subr.bf16.mxu0 %v765_v61  ;;  %v777_v37 = vpop.permute.xlu1 %776  ;;  %v813_v29 = vrot.slane %v1409_v46, %v1667_v23  ;;  %v1410_v9 = vld [vmem:[%s2398_s1 + $0x2] ss:$8 sm:$0xf] }
 0x289   :  { %v790_v30 = vsel %vm113_vm2, %v777_v37, %v2037_v45  ;;  %v792_v41 = vsel %vm113_vm2, %v2026_v42, %v777_v37  ;;  %v867_v37 = vrot.slane %v1410_v9, %v1639_v11 }
 0x28a   :  { %v764_v32 = vpack.c.bf16 %v760_v19, %v756_v17  ;;  %v779_v26 = vpop.permute.xlu0 %778  ;;  %v767_v38 = vpack.c.bf16 %v763_v24, %v759_v40  ;;  %v819_v39 = vmul.f32 %v805_v13, %v792_v41  ;;  %v820_v44 = vmul.f32 %v809_v15, %v790_v30 }
 0x28b   :  { %v791_v25 = vsel %vm113_vm2, %v779_v26, %v2042_v47  ;;  %v793_v61 = vsel %vm113_vm2, %v2028_v43, %v779_v26 }
 0x28c   :  { %v823_v14 = vmul.f32 %v805_v13, %v793_v61  ;;  %v824_v18 = vmul.f32 %v809_v15, %v791_v25  ;;  %1277 = vmatpush1.bf16.msra.mxu0 %v764_v32  ;;  %1319 = vmatprep.subr.bf16.mxu1 %v767_v38  ;;  %v785_v63 = vpop.permute.xlu1 %784  ;;  %v863_v25 = vrot.slane %v1410_v9, %v1659_v21 }
 0x28d   :  { %v788_v17 = vsel %vm113_vm2, %v2037_v45, %v785_v63  ;;  %v794_v40 = vsel %vm113_vm2, %v785_v63, %v2026_v42  ;;  %1320 = vmatpush1.bf16.msra.mxu1 %v766_v28  ;;  %v871_v45 = vrot.slane %v1410_v9, %v1657_v20 }
 0x28e   :  { %v828_v46 = vpack.c.bf16 %v824_v18, %v820_v44  ;;  %v787_v19 = vpop.permute.xlu0 %786  ;;  %v827_v13 = vpack.c.bf16 %v823_v14, %v819_v39  ;;  %v818_v30 = vmul.f32 %v801_v34, %v794_v40  ;;  %v821_v41 = vmul.f32 %v813_v29, %v788_v17  ;;  %v1411_v40 = vld [vmem:[%s2398_s1 + $0x3] ss:$8 sm:$0xf] }
 0x28f   :  { %v789_v15 = vsel %vm113_vm2, %v2042_v47, %v787_v19  ;;  %v795_v24 = vsel %vm113_vm2, %v787_v19, %v2028_v43  ;;  %v875_v44 = vrot.slane %v1410_v9, %v1667_v23 }
 0x290   :  { %v822_v32 = vmul.f32 %v801_v34, %v795_v24  ;;  %v825_v42 = vmul.f32 %v813_v29, %v789_v15  ;;  %1278 = vmatprep.subr.bf16.mxu0 %v827_v13  ;;  %v839_v28 = vpop.permute.xlu1 %838 }
 0x291   :  { %v852_v26 = vsel %vm177_vm3, %v839_v28, %v2048_v50  ;;  %v854_v47 = vsel %vm177_vm3, %v2044_v48, %v839_v28 }
 0x292   :  { %v826_v38 = vpack.c.bf16 %v822_v32, %v818_v30  ;;  %v841_v43 = vpop.permute.xlu0 %840  ;;  %v829_v39 = vpack.c.bf16 %v825_v42, %v821_v41  ;;  %v881_v61 = vmul.f32 %v867_v37, %v854_v47  ;;  %v882_v14 = vmul.f32 %v871_v45, %v852_v26 }
 0x293   :  { %v853_v34 = vsel %vm177_vm3, %v841_v43, %v2050_v51  ;;  %v855_v29 = vsel %vm177_vm3, %v2046_v49, %v841_v43  ;;  %v929_v30 = vrot.slane %v1411_v40, %v1639_v11 }
 0x294   :  { %v885_v18 = vmul.f32 %v867_v37, %v855_v29  ;;  %v886_v63 = vmul.f32 %v871_v45, %v853_v34  ;;  %1279 = vmatpush1.bf16.msra.mxu0 %v826_v38  ;;  %1321 = vmatprep.subr.bf16.mxu1 %v829_v39  ;;  %v847_v17 = vpop.permute.xlu1 %846  ;;  %v925_v38 = vrot.slane %v1411_v40, %v1659_v21 }
 0x295   :  { %v850_v19 = vsel %vm177_vm3, %v2048_v50, %v847_v17  ;;  %v856_v13 = vsel %vm177_vm3, %v847_v17, %v2044_v48  ;;  %1322 = vmatpush1.bf16.msra.mxu1 %v828_v46  ;;  %v933_v50 = vrot.slane %v1411_v40, %v1657_v20 }
 0x296   :  { %v890_v9 = vpack.c.bf16 %v886_v63, %v882_v14  ;;  %v849_v15 = vpop.permute.xlu0 %848  ;;  %v889_v24 = vpack.c.bf16 %v885_v18, %v881_v61  ;;  %v880_v41 = vmul.f32 %v863_v25, %v856_v13  ;;  %v883_v32 = vmul.f32 %v875_v44, %v850_v19  ;;  %v1412_v18 = vld [vmem:[%s2398_s1 + $0x5] ss:$8 sm:$0xf] }
 0x297   :  { %v851_v37 = vsel %vm177_vm3, %v2050_v51, %v849_v15  ;;  %v857_v45 = vsel %vm177_vm3, %v849_v15, %v2046_v49  ;;  %v937_v61 = vrot.slane %v1411_v40, %v1667_v23 }
 0x298   :  { %v884_v42 = vmul.f32 %v863_v25, %v857_v45  ;;  %v887_v48 = vmul.f32 %v875_v44, %v851_v37  ;;  %1280 = vmatprep.subr.bf16.mxu0 %v889_v24  ;;  %v901_v46 = vpop.permute.xlu1 %900  ;;  %v999_v37 = vrot.slane %v1412_v18, %v1639_v11 }
 0x299   :  { %v914_v28 = vsel %vm241_vm4, %v901_v46, %v2056_v54  ;;  %v916_v51 = vsel %vm241_vm4, %v2052_v52, %v901_v46 }
 0x29a   :  { %v888_v26 = vpack.c.bf16 %v884_v42, %v880_v41  ;;  %v903_v49 = vpop.permute.xlu0 %902  ;;  %v891_v47 = vpack.c.bf16 %v887_v48, %v883_v32  ;;  %v943_v43 = vmul.f32 %v929_v30, %v916_v51  ;;  %v944_v34 = vmul.f32 %v933_v50, %v914_v28 }
 0x29b   :  { %v915_v39 = vsel %vm241_vm4, %v903_v49, %v2058_v0  ;;  %v917_v25 = vsel %vm241_vm4, %v2054_v53, %v903_v49  ;;  %v959_v41 = vpack.c.bf16 %v1951_v33, %v1947_v31  ;;  %v995_v32 = vrot.slane %v1412_v18, %v1659_v21  ;;  %v1413_v33 = vld [vmem:[%s2398_s1 + $0x6] ss:$8 sm:$0xf] }
 0x29c   :  { %v947_v29 = vmul.f32 %v929_v30, %v917_v25  ;;  %v948_v44 = vmul.f32 %v933_v50, %v915_v39  ;;  %1281 = vmatpush1.bf16.msra.mxu0 %v888_v26  ;;  %1323 = vmatprep.subr.bf16.mxu1 %v891_v47  ;;  %v909_v14 = vpop.permute.xlu1 %908  ;;  %v961_v48 = vpack.c.bf16 %v1959_v36, %v1955_v35 }
 0x29d   :  { %v912_v63 = vsel %vm241_vm4, %v2056_v54, %v909_v14  ;;  %v918_v17 = vsel %vm241_vm4, %v909_v14, %v2052_v52  ;;  %1324 = vmatpush1.bf16.msra.mxu1 %v890_v9  ;;  %v1003_v51 = vrot.slane %v1412_v18, %v1657_v20  ;;  %v1007_v31 = vrot.slane %v1412_v18, %v1667_v23 }
 0x29e   :  { %v952_v40 = vpack.c.bf16 %v948_v44, %v944_v34  ;;  %v911_v19 = vpop.permute.xlu0 %910  ;;  %v951_v13 = vpack.c.bf16 %v947_v29, %v943_v43  ;;  %v942_v45 = vmul.f32 %v925_v38, %v918_v17  ;;  %v945_v54 = vmul.f32 %v937_v61, %v912_v63 }
 0x29f   :  { %v913_v15 = vsel %vm241_vm4, %v2058_v0, %v911_v19  ;;  %v919_v24 = vsel %vm241_vm4, %v911_v19, %v2054_v53  ;;  %v1057_v25 = vrot.slane %v1413_v33, %v1659_v21  ;;  %v1061_v44 = vrot.slane %v1413_v33, %v1639_v11 }
 0x2a0   :  { %v946_v30 = vmul.f32 %v925_v38, %v919_v24  ;;  %v949_v50 = vmul.f32 %v937_v61, %v913_v15  ;;  %1282 = vmatprep.subr.bf16.mxu0 %v951_v13  ;;  %v971_v52 = vpop.permute.xlu1 %970 }
 0x2a1   :  { %v984_v9 = vsel %vm313_vm5, %v971_v52, %v2064_v7  ;;  %v986_v35 = vsel %vm313_vm5, %v2060_v2, %v971_v52 }
 0x2a2   :  { %v950_v0 = vpack.c.bf16 %v946_v30, %v942_v45  ;;  %v973_v42 = vpop.permute.xlu0 %972  ;;  %v953_v53 = vpack.c.bf16 %v949_v50, %v945_v54  ;;  %v1013_v36 = vmul.f32 %v999_v37, %v984_v9  ;;  %v1012_v34 = vmul.f32 %v995_v32, %v986_v35  ;;  %v1414_v9 = vld [vmem:[%s2398_s1 + $0x7] ss:$8 sm:$0xf] }
 0x2a3   :  { %v985_v46 = vsel %vm313_vm5, %v973_v42, %v2066_v55  ;;  %v987_v28 = vsel %vm313_vm5, %v2062_v6, %v973_v42  ;;  %v1069_v30 = vrot.slane %v1413_v33, %v1667_v23 }
 0x2a4   :  { %v1017_v26 = vmul.f32 %v999_v37, %v985_v46  ;;  %1283 = vmatpush1.bf16.msra.mxu0 %v950_v0  ;;  %1325 = vmatprep.subr.bf16.mxu1 %v953_v53  ;;  %v979_v49 = vpop.permute.xlu1 %978  ;;  %v1016_v43 = vmul.f32 %v995_v32, %v987_v28  ;;  %v1119_v28 = vrot.slane %v1414_v9, %v1659_v21 }
 0x2a5   :  { %v982_v47 = vsel %vm313_vm5, %v2064_v7, %v979_v49  ;;  %v988_v38 = vsel %vm313_vm5, %v979_v49, %v2060_v2  ;;  %1284 = vmatprep.subr.bf16.mxu0 %v959_v41  ;;  %1326 = vmatpush1.bf16.msra.mxu1 %v952_v40  ;;  %v2406_v40 = vpack.c.bf16 %v1875_v16, %v1873_v12 }
 0x2a6   :  { %v981_v39 = vpop.permute.xlu0 %980  ;;  %1327 = vmatprep.subr.bf16.mxu1 %v961_v48  ;;  %v1021_v61 = vpack.c.bf16 %v1017_v26, %v1013_v36  ;;  %v1014_v2 = vmul.f32 %v1003_v51, %v982_v47  ;;  %v1015_v14 = vmul.f32 %v1007_v31, %v988_v38  ;;  %v1020_v13 = vpack.c.bf16 %v1016_v43, %v1012_v34 }
 0x2a7   :  { %v983_v29 = vsel %vm313_vm5, %v2066_v55, %v981_v39  ;;  %v989_v7 = vsel %vm313_vm5, %v981_v39, %v2062_v6  ;;  %v2407_v6 = vpack.c.bf16 %v1885_v27, %v1879_v22  ;;  %v1065_v12 = vrot.slane %v1413_v33, %v1657_v20 }
 0x2a8   :  { %v1018_v18 = vmul.f32 %v1003_v51, %v983_v29  ;;  %v1019_v63 = vmul.f32 %v1007_v31, %v989_v7  ;;  %v1033_v17 = vpop.permute.xlu1 %1032  ;;  %1285 = vmatpush1.bf16.msra.mxu0 %v2406_v40  ;;  %v1127_v43 = vrot.slane %v1414_v9, %v1657_v20  ;;  %v1131_v39 = vrot.slane %v1414_v9, %v1667_v23 }
 0x2a9   :  { %v1046_v19 = vsel %vm377_vm6, %v1033_v17, %v2072_v1  ;;  %v1048_v55 = vsel %vm377_vm6, %v2068_v56, %v1033_v17  ;;  %1286 = vmatprep.subr.bf16.mxu0 %v1021_v61  ;;  %1328 = vmatpush1.bf16.msra.mxu1 %v2407_v6 }
 0x2aa   :  { %v1022_v15 = vpack.c.bf16 %v1018_v18, %v1014_v2  ;;  %v1035_v24 = vpop.permute.xlu0 %1034  ;;  %v1023_v37 = vpack.c.bf16 %v1019_v63, %v1015_v14  ;;  %v1074_v16 = vmul.f32 %v1057_v25, %v1048_v55  ;;  %v1075_v50 = vmul.f32 %v1061_v44, %v1046_v19 }
 0x2ab   :  { %v1047_v45 = vsel %vm377_vm6, %v1035_v24, %v2074_v3  ;;  %v1049_v54 = vsel %vm377_vm6, %v2070_v57, %v1035_v24 }
 0x2ac   :  { %v1078_v22 = vmul.f32 %v1057_v25, %v1049_v54  ;;  %v1079_v27 = vmul.f32 %v1061_v44, %v1047_v45  ;;  %1329 = vmatprep.subr.bf16.mxu1 %v1023_v37  ;;  %v1041_v52 = vpop.permute.xlu1 %1040  ;;  %1287 = vmatpush1.bf16.msra.mxu0 %v1020_v13  ;;  %v1415_v44 = vld [vmem:[%s2398_s1 + $0x20] ss:$8 sm:$0xf] }
 0x2ad   :  { %v1044_v41 = vsel %vm377_vm6, %v2072_v1, %v1041_v52  ;;  %v1050_v0 = vsel %vm377_vm6, %v1041_v52, %v2068_v56  ;;  %1330 = vmatpush1.bf16.msra.mxu1 %v1022_v15  ;;  %v1123_v1 = vrot.slane %v1414_v9, %v1639_v11  ;;  %v1181_v55 = vrot.slane %v1415_v44, %v1659_v21 }
 0x2ae   :  { %v1082_v32 = vpack.c.bf16 %v1078_v22, %v1074_v16  ;;  %v1043_v42 = vpop.permute.xlu0 %1042  ;;  %v1083_v53 = vpack.c.bf16 %v1079_v27, %v1075_v50  ;;  %v1076_v51 = vmul.f32 %v1065_v12, %v1044_v41  ;;  %v1077_v31 = vmul.f32 %v1069_v30, %v1050_v0  ;;  %v2408_v16 = vld [vmem:[#allocation3_spill] sm:$0xff] }
 0x2af   :  { %v1045_v48 = vsel %vm377_vm6, %v2074_v3, %v1043_v42  ;;  %v1051_v46 = vsel %vm377_vm6, %v1043_v42, %v2070_v57  ;;  %v1189_v54 = vrot.slane %v1415_v44, %v1657_v20 }
 0x2b0   :  { %v1080_v33 = vmul.f32 %v1065_v12, %v1045_v48  ;;  %v1081_v56 = vmul.f32 %v1069_v30, %v1051_v46  ;;  %v1095_v35 = vpop.permute.xlu1 %1094  ;;  %1288 = vmatprep.subr.bf16.mxu0 %v1083_v53  ;;  %v1193_v30 = vrot.slane %v1415_v44, %v1667_v23 }
 0x2b1   :  { %v1108_v36 = vsel %vm441_vm7, %v1095_v35, %v2080_v4  ;;  %v1110_v3 = vsel %vm441_vm7, %v2076_v58, %v1095_v35  ;;  %1289 = vmatpush1.bf16.msra.mxu0 %v1082_v32  ;;  %v1363_v35 = vld [vmem:[%s2397_s0 + $0x8] sm:$0xff] }
 0x2b2   :  { %v1084_v57 = vpack.c.bf16 %v1080_v33, %v1076_v51  ;;  %v1097_v26 = vpop.permute.xlu0 %1096  ;;  %v1085_v49 = vpack.c.bf16 %v1081_v56, %v1077_v31  ;;  %v1136_v25 = vmul.f32 %v1119_v28, %v1110_v3  ;;  %v1137_v61 = vmul.f32 %v1123_v1, %v1108_v36 }
 0x2b3   :  { %v1109_v47 = vsel %vm441_vm7, %v1097_v26, %v2082_v5  ;;  %v1111_v38 = vsel %vm441_vm7, %v2078_v59, %v1097_v26  ;;  %v1366_v26 = vld [vmem:[%s2397_s0 + $0x20] sm:$0xff] }
 0x2b4   :  { %v1140_v34 = vmul.f32 %v1119_v28, %v1111_v38  ;;  %v1141_v29 = vmul.f32 %v1123_v1, %v1109_v47  ;;  %1331 = vmatprep.subr.bf16.mxu1 %v1085_v49  ;;  %v1103_v7 = vpop.permute.xlu1 %1102 }
 0x2b5   :  { %v1106_v2 = vsel %vm441_vm7, %v2080_v4, %v1103_v7  ;;  %v1112_v14 = vsel %vm441_vm7, %v1103_v7, %v2076_v58  ;;  %1332 = vmatpush1.bf16.msra.mxu1 %v1084_v57  ;;  %v1185_v4 = vrot.slane %v1415_v44, %v1639_v11 }
 0x2b6   :  { %v1144_v18 = vpack.c.bf16 %v1140_v34, %v1136_v25  ;;  %v1105_v63 = vpop.permute.xlu0 %1104  ;;  %v1145_v17 = vpack.c.bf16 %v1141_v29, %v1137_v61  ;;  %v1138_v6 = vmul.f32 %v1127_v43, %v1106_v2  ;;  %v1139_v13 = vmul.f32 %v1131_v39, %v1112_v14  ;;  %v1364_v34 = vld [vmem:[%s2397_s0 + $0x10] sm:$0xff]  ;;  %v1365_v14 = vld [vmem:[%s2397_s0 + $0x18] sm:$0xff] }
 0x2b7   :  { %v1107_v40 = vsel %vm441_vm7, %v2082_v5, %v1105_v63  ;;  %v1113_v19 = vsel %vm441_vm7, %v1105_v63, %v2078_v59 }
 0x2b8   :  { %v1142_v15 = vmul.f32 %v1127_v43, %v1107_v40  ;;  %v1143_v58 = vmul.f32 %v1131_v39, %v1113_v19  ;;  %v1157_v24 = vpop.permute.xlu1 %1156  ;;  %1290 = vmatprep.subr.bf16.mxu0 %v1145_v17  ;;  %v1367_v43 = vld [vmem:[%s2397_s0 + $0x28] sm:$0xff]  ;;  %v1368_v19 = vld [vmem:[%s2397_s0 + $0x30] sm:$0xff] }
 0x2b9   :  { %v1170_v37 = vsel %vm505_vm8, %v1157_v24, %v2088_v62  ;;  %v1172_v5 = vsel %vm505_vm8, %v2084_v60, %v1157_v24  ;;  %1291 = vmatpush1.bf16.msra.mxu0 %v1144_v18 }
 0x2ba   :  { %v1146_v59 = vpack.c.bf16 %v1142_v15, %v1138_v6  ;;  %v1159_v12 = vpop.permute.xlu0 %1158  ;;  %v1147_v21 = vpack.c.bf16 %v1143_v58, %v1139_v13  ;;  %v1198_v50 = vmul.f32 %v1181_v55, %v1172_v5  ;;  %v1199_v22 = vmul.f32 %v1185_v4, %v1170_v37  ;;  %v1369_v15 = vld [vmem:[%s2397_s0 + $0x38] sm:$0xff] }
 0x2bb   :  { %v1171_v11 = vsel %vm505_vm8, %v1159_v12, %v2093_v8  ;;  %v1173_v45 = vsel %vm505_vm8, %v2408_v16, %v1159_v12 }
 0x2bc   :  { %v1202_v27 = vmul.f32 %v1181_v55, %v1173_v45  ;;  %v1203_v52 = vmul.f32 %v1185_v4, %v1171_v11  ;;  %1333 = vmatprep.subr.bf16.mxu1 %v1147_v21  ;;  %v1165_v9 = vpop.permute.xlu1 %1164 }
 0x2bd   :  { %v1168_v41 = vsel %vm505_vm8, %v2088_v62, %v1165_v9  ;;  %v1174_v0 = vsel %vm505_vm8, %v1165_v9, %v2084_v60  ;;  %1334 = vmatpush1.bf16.msra.mxu1 %v1146_v59  ;;  %v1436_v60 = vld [vmem:[%s2401_s4] ss:$8 sps:$4 sm:$0xff]  }
 0x2be   :  { %v1206_v32 = vpack.c.bf16 %v1202_v27, %v1198_v50  ;;  %v1167_v42 = vpop.permute.xlu0 %1166  ;;  %v1207_v20 = vpack.c.bf16 %v1203_v52, %v1199_v22  ;;  %v1200_v48 = vmul.f32 %v1189_v54, %v1168_v41  ;;  %v1201_v46 = vmul.f32 %v1193_v30, %v1174_v0 }
 0x2bf   :  { %v1169_v23 = vsel %vm505_vm8, %v2093_v8, %v1167_v42  ;;  %v1175_v53 = vsel %vm505_vm8, %v1167_v42, %v2408_v16 }
 0x2c0   :  { %v1204_v28 = vmul.f32 %v1189_v54, %v1169_v23  ;;  %v1205_v62 = vmul.f32 %v1193_v30, %v1175_v53  ;;  %1292 = vmatprep.subr.bf16.mxu0 %v1207_v20 }
 0x2c1   :  { %1293 = vmatpush1.bf16.msra.mxu0 %v1206_v32 }
 0x2c2   :  { %v1208_v1 = vpack.c.bf16 %v1204_v28, %v1200_v48  ;;  %v1209_v51 = vpack.c.bf16 %v1205_v62, %v1201_v46 }
 0x2c4   :  { %1309 = vmatmul.mubr.bf16.vlgmr.msra.gmra.mrb[4].mxu0 %v1436_v60  ;;  %1335 = vmatprep.subr.bf16.mxu1 %v1209_v51 }
 0x2c5   :  { %1336 = vmatpush1.bf16.msra.mxu1 %v1208_v1 }
 0x2c8   :  { %1352 = vmatmul.mubr.bf16.vlgmr.msra.gmra.mrb[4].mxu1 %v1436_v60 }
 0x2cd   :  { %v1257_v8 = vpop.permute.xlu1 %1256 }
 0x2cf   :  { %v1262_v36 = vpop.permute.xlu0 %1261 }
 0x397   :  { %v1310_v31 = vpop.f32.mrb[4].mxu0 }
 0x398   :  { %v1311_v33 = vadd.f32 %v1310_v31, %v1257_v8  ;;  %v1312_v56 = vpop.f32.mrb[5].mxu0 }
 0x399   :  { %v1313_v3 = vadd.f32 %v1312_v56, %v1257_v8  ;;  %v1314_v57 = vpop.f32.mrb[6].mxu0 }
 0x39a   :  { %v1370_v49 = vadd.f32 %v1362_v10, %v1311_v33  ;;  %v1315_v47 = vadd.f32 %v1314_v57, %v1262_v36  ;;  %v1316_v38 = vpop.f32.mrb[7].mxu0 }
 0x39b   :  { %v1371_v39 = vadd.f32 %v1363_v35, %v1313_v3  ;;  %v1317_v25 = vadd.f32 %v1316_v38, %v1262_v36  ;;  %v1353_v61 = vpop.f32.mrb[4].mxu1 }
 0x39c   :  { %v1378_v29 = vmax.f32 %v1370_v49, 0.0  ;;  %v1374_v7 = vadd.f32 %v1366_v26, %v1315_v47  ;;  %v1354_v44 = vadd.f32 %v1353_v61, %v1257_v8  ;;  %v1355_v2 = vpop.f32.mrb[5].mxu1 }
 0x39d   :  { %v1379_v18 = vmax.f32 %v1371_v39, 0.0  ;;  %v1375_v63 = vadd.f32 %v1367_v43, %v1317_v25  ;;  %v1356_v17 = vadd.f32 %v1355_v2, %v1257_v8  ;;  %v1357_v40 = vpop.f32.mrb[6].mxu1 }
 0x39e   :  { %1386 = vst [vmem:[%s2403_s6] sm:$0xff] %v1378_v29  ;;  %v1382_v55 = vmax.f32 %v1374_v7, 0.0  ;;  %v1372_v4 = vadd.f32 %v1364_v34, %v1354_v44  ;;  %v1358_v6 = vadd.f32 %v1357_v40, %v1262_v36  ;;  %v1359_v13 = vpop.f32.mrb[7].mxu1 }
 0x39f   :  { %1387 = vst [vmem:[%s2403_s6 + $0x8] sm:$0xff] %v1379_v18  ;;  %v1383_v58 = vmax.f32 %v1375_v63, 0.0  ;;  %v1373_v24 = vadd.f32 %v1365_v14, %v1356_v17  ;;  %v1360_v37 = vadd.f32 %v1359_v13, %v1262_v36 }
 0x3a0   :  { %1390 = vst [vmem:[%s2403_s6 + $0x20] sm:$0xff] %v1382_v55  ;;  %v1380_v5 = vmax.f32 %v1372_v4, 0.0  ;;  %v1376_v59 = vadd.f32 %v1368_v19, %v1358_v6 }
 0x3a1   :  { %1391 = vst [vmem:[%s2403_s6 + $0x28] sm:$0xff] %v1383_v58  ;;  %v1381_v12 = vmax.f32 %v1373_v24, 0.0  ;;  %v1377_v21 = vadd.f32 %v1369_v15, %v1360_v37 }
 0x3a2   :  { %1388 = vst [vmem:[%s2403_s6 + $0x10] sm:$0xff] %v1380_v5  ;;  %v1384_v11 = vmax.f32 %v1376_v59, 0.0 }
 0x3a3   :  { %1389 = vst [vmem:[%s2403_s6 + $0x18] sm:$0xff] %v1381_v12  ;;  %v1385_v16 = vmax.f32 %v1377_v21, 0.0 }
 0x3a4   :  { %1392 = vst [vmem:[%s2403_s6 + $0x30] sm:$0xff] %v1384_v11 }
 0x3a5   :  { %1393 = vst [vmem:[%s2403_s6 + $0x38] sm:$0xff] %v1385_v16 }

</bundles_post_ra>
